<compile_context>
chip_gen: v7x
topology: tpu7x:2x2x1
jax: 0.10.0
libtpu: 0.0.40
codegen_flags: <defaults>
</compile_context>

<pallas_src>
import math

import jax
import jax.numpy as jnp
from jax.experimental import pallas as pl
from jax.experimental.pallas import tpu as pltpu

# ----------------------- small GPT-2 config -----------------------
B = 2          # batch
T = 8          # sequence length
D = 32         # hidden size
H = 2          # attention heads
HD = D // H    # head dim
FF = 4 * D     # MLP inner dim
L = 2          # transformer layers
V = 64         # vocab size
MAXPOS = 16    # max positions


# ----------------------- in-kernel helpers -----------------------

def _mm(a, w_bf16):
    """MXU matmul: cast activation to bf16 (weight already bf16), f32 accumulation."""
    return jnp.dot(a.astype(jnp.bfloat16), w_bf16, preferred_element_type=jnp.float32)


def _dot_nt(a, b):
    """a[m,k] . b[n,k] -> [m,n] contracting last dims (no explicit transpose of b)."""
    return jax.lax.dot_general(
        a.astype(jnp.bfloat16), b.astype(jnp.bfloat16),
        dimension_numbers=(((1,), (1,)), ((), ())),
        preferred_element_type=jnp.float32)


def _ln(x, g, b):
    mu = jnp.mean(x, axis=-1, keepdims=True)
    var = jnp.mean(jnp.square(x - mu), axis=-1, keepdims=True)
    return (x - mu) * jax.lax.rsqrt(var + 1e-5) * g + b


# ----------------------- fused forward kernel (one sequence per grid step) ---------

def _fused_gpt_kernel(idx_ref,                     # SMEM scalar prefetch: last_idx [B]
                      am_ref, x_ref,               # [1,1,T] f32 pad mask, [1,T,D] f32 emb
                      ln1g_ref, ln1b_ref,          # [L,1,D] f32
                      wqkv_ref, bqkv_ref,          # [L,D,3D] bf16 (scale folded), [L,1,3D] f32
                      wo_ref, bo_ref,              # [L,D,D] bf16, [L,1,D] f32
                      ln2g_ref, ln2b_ref,          # [L,1,D] f32
                      w1_ref, b1_ref,              # [L,D,FF] bf16, [L,1,FF] f32
                      w2_ref, b2_ref,              # [L,FF,D] bf16, [L,1,D] f32
                      lnfg_ref, lnfb_ref,          # [1,D] f32
                      wteT_ref,                    # [D,V] bf16 (tied head, pre-transposed)
                      o_ref,                       # out: logits [1,1,V] f32
                      hf_ref, attn_ref):           # VMEM scratch [T,D] f32 each
    f32 = jnp.float32
    b = pl.program_id(0)

    # Additive causal + key-padding mask, built ONCE per sequence (hoisted out of the
    # layer loop).  Pure VPU work on a [T,T] tile.
    row = jax.lax.broadcasted_iota(jnp.int32, (T, T), 0)
    col = jax.lax.broadcasted_iota(jnp.int32, (T, T), 1)
    causal = row >= col                                      # [T,T] bool
    pad = am_ref[0] > 0.5                                    # [1,T] bool (key mask)
    amask = jnp.where(jnp.logical_and(causal, pad), 0.0, -1e4).astype(f32)

    h = x_ref[0]                                             # [T, D] f32
    for l in range(L):
        # ---- attention block (pre-LN); 1/sqrt(HD) folded into wq/bq at pack time ----
        a_in = _ln(h, ln1g_ref[l], ln1b_ref[l])
        qkv = _mm(a_in, wqkv_ref[l]) + bqkv_ref[l]           # [T, 3D] f32
        for hh in range(H):
            q = qkv[:, hh * HD:(hh + 1) * HD]                        # [T, HD]
            k = qkv[:, D + hh * HD:D + (hh + 1) * HD]
            v = qkv[:, 2 * D + hh * HD:2 * D + (hh + 1) * HD]
            s = _dot_nt(q, k) + amask                        # [T, T] (no k.T)
            s = s - jnp.max(s, axis=-1, keepdims=True)
            p = jnp.exp(s)
            p = p * pl.reciprocal(jnp.sum(p, axis=-1, keepdims=True), approx=True)
            # Write each head's output at its static column slice -- no concatenates.
            attn_ref[:, hh * HD:(hh + 1) * HD] = _mm(p, v)
        h = h + _mm(attn_ref[...], wo_ref[l]) + bo_ref[l]

        # ---- MLP block (pre-LN, gelu_new) ----
        m_in = _ln(h, ln2g_ref[l], ln2b_ref[l])
        m = jax.nn.gelu(_mm(m_in, w1_ref[l]) + b1_ref[l], approximate=True)
        h = h + _mm(m, w2_ref[l]) + b2_ref[l]

    # Gather the last non-padded row FIRST (dynamic sublane slice of VMEM scratch),
    # then apply the final LayerNorm to just that [1, D] row.
    hf_ref[...] = h
    last = hf_ref[pl.ds(idx_ref[b], 1), :]                   # [1, D]
    last = _ln(last, lnfg_ref[...], lnfb_ref[...])

    # Weight-tied vocab head: pre-transposed [D, V] bf16 operand -> plain MXU matmul.
    logits = _mm(last, wteT_ref[...])                        # [1, V] f32
    o_ref[...] = logits.reshape(1, 1, V).astype(o_ref.dtype)


# ----------------------- pallas_call wrapper -----------------------

_WEIGHT_KEYS = ("ln1_g", "ln1_b", "wqkv", "bqkv", "wo", "bo",
                "ln2_g", "ln2_b", "w1", "b1", "w2", "b2",
                "lnf_g", "lnf_b", "wte_t")


def _const_spec(shape):
    zeros = (0,) * len(shape)
    return pl.BlockSpec(shape, lambda b, idx, _z=zeros: _z)


def fused_forward(last_idx, am3, x3, pk):
    """Single pallas_call running the whole GPT forward; returns logits [B, V].

    grid=(B,), "parallel": one sequence per grid step (one per TensorCore on v7x).
    VMEM footprint (weights + activations + scratch) is ~0.1 MB -- trivial against the
    32 MiB scoped default on every generation (v7x physical VMEM is 64 MiB, not 128).
    """
    weights = [pk[k] for k in _WEIGHT_KEYS]
    grid_spec = pltpu.PrefetchScalarGridSpec(
        num_scalar_prefetch=1,
        grid=(B,),
        in_specs=[pl.BlockSpec((1, 1, T), lambda b, idx: (b, 0, 0)),   # pad mask row
                  pl.BlockSpec((1, T, D), lambda b, idx: (b, 0, 0))]   # embeddings slab
                 + [_const_spec(w.shape) for w in weights],            # weights: block 0
        out_specs=pl.BlockSpec((1, 1, V), lambda b, idx: (b, 0, 0)),
        scratch_shapes=[pltpu.VMEM((T, D), jnp.float32),   # pre-final-LN hidden (gather)
                        pltpu.VMEM((T, D), jnp.float32)],  # per-head attention output
    )
    out = pl.pallas_call(
        _fused_gpt_kernel,
        out_shape=jax.ShapeDtypeStruct((B, 1, V), jnp.float32),
        grid_spec=grid_spec,
        compiler_params=pltpu.CompilerParams(dimension_semantics=("parallel",)),
    )(last_idx, am3, x3, *weights)
    return out.reshape(B, V)


# ----------------------- parameter init (deterministic) -----------------------

def init_params(key):
    def nrm(key, shape):
        return 0.02 * jax.random.normal(key, shape, dtype=jnp.float32)

    keys = jax.random.split(key, 2 + L)
    params = {
        "wte": nrm(keys[0], (V, D)),
        "wpe": nrm(keys[1], (MAXPOS, D)),
        "lnf_g": jnp.ones((1, D), jnp.float32),
        "lnf_b": jnp.zeros((1, D), jnp.float32),
        "layers": [],
    }
    for l in range(L):
        lk = jax.random.split(keys[2 + l], 6)
        params["layers"].append({
            "ln1_g": jnp.ones((1, D), jnp.float32),
            "ln1_b": jnp.zeros((1, D), jnp.float32),
            "wq": nrm(lk[0], (D, D)), "bq": jnp.zeros((1, D), jnp.float32),
            "wk": nrm(lk[1], (D, D)), "bk": jnp.zeros((1, D), jnp.float32),
            "wv": nrm(lk[2], (D, D)), "bv": jnp.zeros((1, D), jnp.float32),
            "wo": nrm(lk[3], (D, D)), "bo": jnp.zeros((1, D), jnp.float32),
            "ln2_g": jnp.ones((1, D), jnp.float32),
            "ln2_b": jnp.zeros((1, D), jnp.float32),
            "w1": nrm(lk[4], (D, FF)), "b1": jnp.zeros((1, FF), jnp.float32),
            "w2": nrm(lk[5], (FF, D)), "b2": jnp.zeros((1, D), jnp.float32),
        })
    return params


def pack_params(params):
    """Stack per-layer weights on a leading L axis, fuse QKV, fold the attention scale,
    pre-cast matmul weights to bf16 and pre-transpose the tied head to [D, V]."""
    scale = 1.0 / math.sqrt(HD)
    bf16 = jnp.bfloat16
    ls = params["layers"]
    return {
        "ln1_g": jnp.stack([p["ln1_g"] for p in ls]),
        "ln1_b": jnp.stack([p["ln1_b"] for p in ls]),
        "wqkv": jnp.stack([jnp.concatenate(
            [p["wq"] * scale, p["wk"], p["wv"]], axis=1) for p in ls]).astype(bf16),
        "bqkv": jnp.stack([jnp.concatenate(
            [p["bq"] * scale, p["bk"], p["bv"]], axis=1) for p in ls]),
        "wo": jnp.stack([p["wo"] for p in ls]).astype(bf16),
        "bo": jnp.stack([p["bo"] for p in ls]),
        "ln2_g": jnp.stack([p["ln2_g"] for p in ls]),
        "ln2_b": jnp.stack([p["ln2_b"] for p in ls]),
        "w1": jnp.stack([p["w1"] for p in ls]).astype(bf16),
        "b1": jnp.stack([p["b1"] for p in ls]),
        "w2": jnp.stack([p["w2"] for p in ls]).astype(bf16),
        "b2": jnp.stack([p["b2"] for p in ls]),
        "lnf_g": params["lnf_g"],
        "lnf_b": params["lnf_b"],
        "wte_t": params["wte"].T.astype(bf16),     # tied head, lane-dense [D, V]
    }


# ----------------------- forward (ParaphraseGPT.forward) -----------------------

def paraphrase_gpt_forward(params, packed, input_ids, attention_mask):
    """input_ids: [B, T] int32, attention_mask: [B, T] int32 -> logits [B, V]."""
    # TODO(synk): the token-embedding gather (wte[input_ids]) has no clean Pallas
    # equivalent at this scale; it stays a single XLA gather feeding the fused kernel.
    x = params["wte"][input_ids] + params["wpe"][jnp.arange(T)][None, :, :]   # [B,T,D]
    am3 = attention_mask.astype(jnp.float32).reshape(B, 1, T)                 # [B,1,T]
    # Last non-padded position per sequence (clamped in case of all-pad input).
    last_idx = jnp.maximum(
        jnp.sum(attention_mask, axis=1).astype(jnp.int32) - 1, 0)             # [B]
    return fused_forward(last_idx, am3, x, packed)                            # [B,V]


# ----------------------- driver -----------------------

if __name__ == "__main__":
    key = jax.random.PRNGKey(0)
    pkey, dkey = jax.random.split(key)
    params = init_params(pkey)
    packed = pack_params(params)

    input_ids = jax.random.randint(dkey, (B, T), 0, V, dtype=jnp.int32)
    # Second sequence has 2 padding positions at the end.
    attention_mask = jnp.array(
        [[1, 1, 1, 1, 1, 1, 1, 1],
         [1, 1, 1, 1, 1, 1, 0, 0]], dtype=jnp.int32)

    fwd = jax.jit(lambda ids, m: paraphrase_gpt_forward(params, packed, ids, m))
    logits = fwd(input_ids, attention_mask)
    jax.block_until_ready(logits)

    assert logits.shape == (B, V), logits.shape
    assert bool(jnp.all(jnp.isfinite(logits)))
    print("KERNEL_OK")
</pallas_src>

<mosaic_0001>
module attributes {stable_mosaic.version = 11 : i64} {
  func.func @_fused_gpt_kernel(%arg0: i32, %arg1: memref<2xi32, #tpu.memory_space<smem>>, %arg2: memref<1x1x8xf32, #tpu.memory_space<vmem>>, %arg3: memref<1x8x32xf32, #tpu.memory_space<vmem>>, %arg4: memref<2x1x32xf32, #tpu.memory_space<vmem>>, %arg5: memref<2x1x32xf32, #tpu.memory_space<vmem>>, %arg6: memref<2x32x96xbf16, #tpu.memory_space<vmem>>, %arg7: memref<2x1x96xf32, #tpu.memory_space<vmem>>, %arg8: memref<2x32x32xbf16, #tpu.memory_space<vmem>>, %arg9: memref<2x1x32xf32, #tpu.memory_space<vmem>>, %arg10: memref<2x1x32xf32, #tpu.memory_space<vmem>>, %arg11: memref<2x1x32xf32, #tpu.memory_space<vmem>>, %arg12: memref<2x32x128xbf16, #tpu.memory_space<vmem>>, %arg13: memref<2x1x128xf32, #tpu.memory_space<vmem>>, %arg14: memref<2x128x32xbf16, #tpu.memory_space<vmem>>, %arg15: memref<2x1x32xf32, #tpu.memory_space<vmem>>, %arg16: memref<1x32xf32, #tpu.memory_space<vmem>>, %arg17: memref<1x32xf32, #tpu.memory_space<vmem>>, %arg18: memref<32x64xbf16, #tpu.memory_space<vmem>>, %arg19: memref<1x1x64xf32, #tpu.memory_space<vmem>>, %arg20: memref<8x32xf32, #tpu.memory_space<vmem>>, %arg21: memref<8x32xf32, #tpu.memory_space<vmem>>) attributes {dimension_semantics = [#tpu.dimension_semantics<parallel>], iteration_bounds = array<i64: 2>, scalar_prefetch = 1 : i64, scratch_operands = 2 : i64, tpu.core_type = #tpu.core_type<tc>, window_params = [{transform_indices = @transform_0, window_bounds = array<i64: 1, 1, 8>}, {transform_indices = @transform_1, window_bounds = array<i64: 1, 8, 32>}, {pipeline_mode = #tpu.pipeline_mode<synchronous>, transform_indices = @transform_2, window_bounds = array<i64: 2, 1, 32>}, {pipeline_mode = #tpu.pipeline_mode<synchronous>, transform_indices = @transform_3, window_bounds = array<i64: 2, 1, 32>}, {pipeline_mode = #tpu.pipeline_mode<synchronous>, transform_indices = @transform_4, window_bounds = array<i64: 2, 32, 96>}, {pipeline_mode = #tpu.pipeline_mode<synchronous>, transform_indices = @transform_5, window_bounds = array<i64: 2, 1, 96>}, {pipeline_mode = #tpu.pipeline_mode<synchronous>, transform_indices = @transform_6, window_bounds = array<i64: 2, 32, 32>}, {pipeline_mode = #tpu.pipeline_mode<synchronous>, transform_indices = @transform_7, window_bounds = array<i64: 2, 1, 32>}, {pipeline_mode = #tpu.pipeline_mode<synchronous>, transform_indices = @transform_8, window_bounds = array<i64: 2, 1, 32>}, {pipeline_mode = #tpu.pipeline_mode<synchronous>, transform_indices = @transform_9, window_bounds = array<i64: 2, 1, 32>}, {pipeline_mode = #tpu.pipeline_mode<synchronous>, transform_indices = @transform_10, window_bounds = array<i64: 2, 32, 128>}, {pipeline_mode = #tpu.pipeline_mode<synchronous>, transform_indices = @transform_11, window_bounds = array<i64: 2, 1, 128>}, {pipeline_mode = #tpu.pipeline_mode<synchronous>, transform_indices = @transform_12, window_bounds = array<i64: 2, 128, 32>}, {pipeline_mode = #tpu.pipeline_mode<synchronous>, transform_indices = @transform_13, window_bounds = array<i64: 2, 1, 32>}, {pipeline_mode = #tpu.pipeline_mode<synchronous>, transform_indices = @transform_14, window_bounds = array<i64: 1, 32>}, {pipeline_mode = #tpu.pipeline_mode<synchronous>, transform_indices = @transform_15, window_bounds = array<i64: 1, 32>}, {pipeline_mode = #tpu.pipeline_mode<synchronous>, transform_indices = @transform_16, window_bounds = array<i64: 32, 64>}, {transform_indices = @transform_17, window_bounds = array<i64: 1, 1, 64>}]} {
    %0 = tpu.iota {dimensions = array<i32: 0>} : vector<8x8xi32>
    %1 = tpu.iota {dimensions = array<i32: 1>} : vector<8x8xi32>
    %2 = arith.cmpi sge, %0, %1 : vector<8x8xi32>
    %c0 = arith.constant 0 : index
    %c0_0 = arith.constant 0 : index
    %c0_1 = arith.constant 0 : index
    %3 = vector.load %arg2[%c0, %c0_0, %c0_1] : memref<1x1x8xf32, #tpu.memory_space<vmem>>, vector<1x1x8xf32>
    %4 = vector.shape_cast %3 : vector<1x1x8xf32> to vector<1x8xf32>
    %cst = arith.constant 5.000000e-01 : f32
    %5 = vector.broadcast %cst : f32 to vector<1x8xf32>
    %6 = arith.cmpf ogt, %4, %5 : vector<1x8xf32>
    %7 = vector.broadcast %6 : vector<1x8xi1> to vector<8x8xi1>
    %8 = arith.andi %2, %7 : vector<8x8xi1>
    %cst_2 = arith.constant 0.000000e+00 : f32
    %cst_3 = arith.constant -1.000000e+04 : f32
    %9 = vector.broadcast %cst_2 : f32 to vector<8x8xf32>
    %10 = vector.broadcast %cst_3 : f32 to vector<8x8xf32>
    %11 = arith.select %8, %9, %10 : vector<8x8xi1>, vector<8x8xf32>
    %c0_4 = arith.constant 0 : index
    %c0_5 = arith.constant 0 : index
    %c0_6 = arith.constant 0 : index
    %12 = vector.load %arg3[%c0_4, %c0_5, %c0_6] : memref<1x8x32xf32, #tpu.memory_space<vmem>>, vector<1x8x32xf32>
    %13 = vector.shape_cast %12 : vector<1x8x32xf32> to vector<8x32xf32>
    %c0_7 = arith.constant 0 : index
    %c0_8 = arith.constant 0 : index
    %c0_9 = arith.constant 0 : index
    %14 = vector.load %arg4[%c0_7, %c0_8, %c0_9] : memref<2x1x32xf32, #tpu.memory_space<vmem>>, vector<1x1x32xf32>
    %15 = vector.shape_cast %14 : vector<1x1x32xf32> to vector<1x32xf32>
    %c0_10 = arith.constant 0 : index
    %c0_11 = arith.constant 0 : index
    %c0_12 = arith.constant 0 : index
    %16 = vector.load %arg5[%c0_10, %c0_11, %c0_12] : memref<2x1x32xf32, #tpu.memory_space<vmem>>, vector<1x1x32xf32>
    %17 = vector.shape_cast %16 : vector<1x1x32xf32> to vector<1x32xf32>
    %cst_13 = arith.constant dense<0.000000e+00> : vector<8xf32>
    %18 = vector.multi_reduction <add>, %13, %cst_13 [1] : vector<8x32xf32> to vector<8xf32>
    %19 = vector.shape_cast %18 : vector<8xf32> to vector<8x1xf32>
    %cst_14 = arith.constant 3.200000e+01 : f32
    %20 = vector.broadcast %cst_14 : f32 to vector<8x1xf32>
    %21 = arith.divf %19, %20 : vector<8x1xf32>
    %22 = vector.broadcast %21 : vector<8x1xf32> to vector<8x32xf32>
    %23 = arith.subf %13, %22 : vector<8x32xf32>
    %24 = arith.mulf %23, %23 : vector<8x32xf32>
    %cst_15 = arith.constant dense<0.000000e+00> : vector<8xf32>
    %25 = vector.multi_reduction <add>, %24, %cst_15 [1] : vector<8x32xf32> to vector<8xf32>
    %26 = vector.shape_cast %25 : vector<8xf32> to vector<8x1xf32>
    %cst_16 = arith.constant 3.200000e+01 : f32
    %27 = vector.broadcast %cst_16 : f32 to vector<8x1xf32>
    %28 = arith.divf %26, %27 : vector<8x1xf32>
    %29 = vector.broadcast %21 : vector<8x1xf32> to vector<8x32xf32>
    %30 = arith.subf %13, %29 : vector<8x32xf32>
    %cst_17 = arith.constant 9.99999974E-6 : f32
    %31 = vector.broadcast %cst_17 : f32 to vector<8x1xf32>
    %32 = arith.addf %28, %31 : vector<8x1xf32>
    %33 = math.rsqrt %32 : vector<8x1xf32>
    %34 = vector.broadcast %33 : vector<8x1xf32> to vector<8x32xf32>
    %35 = arith.mulf %30, %34 : vector<8x32xf32>
    %36 = vector.broadcast %15 : vector<1x32xf32> to vector<8x32xf32>
    %37 = arith.mulf %35, %36 : vector<8x32xf32>
    %38 = vector.broadcast %17 : vector<1x32xf32> to vector<8x32xf32>
    %39 = arith.addf %37, %38 : vector<8x32xf32>
    %c0_18 = arith.constant 0 : index
    %c0_19 = arith.constant 0 : index
    %c0_20 = arith.constant 0 : index
    %40 = vector.load %arg6[%c0_18, %c0_19, %c0_20] : memref<2x32x96xbf16, #tpu.memory_space<vmem>>, vector<1x32x96xbf16>
    %41 = vector.shape_cast %40 : vector<1x32x96xbf16> to vector<32x96xbf16>
    %42 = arith.truncf %39 : vector<8x32xf32> to vector<8x32xbf16>
    %cst_21 = arith.constant dense<0.000000e+00> : vector<8x96xf32>
    %43 = tpu.matmul %42, %41, %cst_21 {dimension_numbers = #tpu.dot_dimension_numbers<[1], [0], [0], [1], [0, 0, 1, 1], [], []>} : vector<8x32xbf16>, vector<32x96xbf16>, vector<8x96xf32> -> vector<8x96xf32>
    %c0_22 = arith.constant 0 : index
    %c0_23 = arith.constant 0 : index
    %c0_24 = arith.constant 0 : index
    %44 = vector.load %arg7[%c0_22, %c0_23, %c0_24] : memref<2x1x96xf32, #tpu.memory_space<vmem>>, vector<1x1x96xf32>
    %45 = vector.shape_cast %44 : vector<1x1x96xf32> to vector<1x96xf32>
    %46 = vector.broadcast %45 : vector<1x96xf32> to vector<8x96xf32>
    %47 = arith.addf %43, %46 : vector<8x96xf32>
    %48 = vector.extract_strided_slice %47 {offsets = [0, 0], sizes = [8, 16], strides = [1, 1]} : vector<8x96xf32> to vector<8x16xf32>
    %49 = vector.extract_strided_slice %47 {offsets = [0, 32], sizes = [8, 16], strides = [1, 1]} : vector<8x96xf32> to vector<8x16xf32>
    %50 = vector.extract_strided_slice %47 {offsets = [0, 64], sizes = [8, 16], strides = [1, 1]} : vector<8x96xf32> to vector<8x16xf32>
    %51 = arith.truncf %48 : vector<8x16xf32> to vector<8x16xbf16>
    %52 = arith.truncf %49 : vector<8x16xf32> to vector<8x16xbf16>
    %cst_25 = arith.constant dense<0.000000e+00> : vector<8x8xf32>
    %53 = tpu.matmul %51, %52, %cst_25 {dimension_numbers = #tpu.dot_dimension_numbers<[1], [1], [0], [0], [0, 0, 1, 0], [], []>} : vector<8x16xbf16>, vector<8x16xbf16>, vector<8x8xf32> -> vector<8x8xf32>
    %54 = arith.addf %53, %11 : vector<8x8xf32>
    %cst_26 = arith.constant dense<0xFF800000> : vector<8xf32>
    %55 = vector.multi_reduction <maximumf>, %54, %cst_26 [1] : vector<8x8xf32> to vector<8xf32>
    %56 = vector.shape_cast %55 : vector<8xf32> to vector<8x1xf32>
    %57 = vector.broadcast %56 : vector<8x1xf32> to vector<8x8xf32>
    %58 = arith.subf %54, %57 : vector<8x8xf32>
    %59 = math.exp %58 : vector<8x8xf32>
    %cst_27 = arith.constant dense<0.000000e+00> : vector<8xf32>
    %60 = vector.multi_reduction <add>, %59, %cst_27 [1] : vector<8x8xf32> to vector<8xf32>
    %61 = vector.shape_cast %60 : vector<8xf32> to vector<8x1xf32>
    %62 = tpu.reciprocal %61 {approx = true} : vector<8x1xf32> -> vector<8x1xf32>
    %63 = vector.broadcast %62 : vector<8x1xf32> to vector<8x8xf32>
    %64 = arith.mulf %59, %63 : vector<8x8xf32>
    %65 = arith.truncf %64 : vector<8x8xf32> to vector<8x8xbf16>
    %cst_28 = arith.constant dense<0.000000e+00> : vector<8x16xf32>
    %66 = tpu.matmul %65, %50, %cst_28 {dimension_numbers = #tpu.dot_dimension_numbers<[1], [0], [0], [1], [0, 0, 1, 1], [], []>} : vector<8x8xbf16>, vector<8x16xf32>, vector<8x16xf32> -> vector<8x16xf32>
    %c0_29 = arith.constant 0 : index
    %c0_30 = arith.constant 0 : index
    %67 = vector.load %arg21[%c0_29, %c0_30] : memref<8x32xf32, #tpu.memory_space<vmem>>, vector<8x16xf32>
    tpu.vector_store %arg21[%c0_29, %c0_30], %66 {strides = array<i32>} : memref<8x32xf32, #tpu.memory_space<vmem>>, vector<8x16xf32>,
    %68 = vector.extract_strided_slice %47 {offsets = [0, 16], sizes = [8, 16], strides = [1, 1]} : vector<8x96xf32> to vector<8x16xf32>
    %69 = vector.extract_strided_slice %47 {offsets = [0, 48], sizes = [8, 16], strides = [1, 1]} : vector<8x96xf32> to vector<8x16xf32>
    %70 = vector.extract_strided_slice %47 {offsets = [0, 80], sizes = [8, 16], strides = [1, 1]} : vector<8x96xf32> to vector<8x16xf32>
    %71 = arith.truncf %68 : vector<8x16xf32> to vector<8x16xbf16>
    %72 = arith.truncf %69 : vector<8x16xf32> to vector<8x16xbf16>
    %cst_31 = arith.constant dense<0.000000e+00> : vector<8x8xf32>
    %73 = tpu.matmul %71, %72, %cst_31 {dimension_numbers = #tpu.dot_dimension_numbers<[1], [1], [0], [0], [0, 0, 1, 0], [], []>} : vector<8x16xbf16>, vector<8x16xbf16>, vector<8x8xf32> -> vector<8x8xf32>
    %74 = arith.addf %73, %11 : vector<8x8xf32>
    %cst_32 = arith.constant dense<0xFF800000> : vector<8xf32>
    %75 = vector.multi_reduction <maximumf>, %74, %cst_32 [1] : vector<8x8xf32> to vector<8xf32>
    %76 = vector.shape_cast %75 : vector<8xf32> to vector<8x1xf32>
    %77 = vector.broadcast %76 : vector<8x1xf32> to vector<8x8xf32>
    %78 = arith.subf %74, %77 : vector<8x8xf32>
    %79 = math.exp %78 : vector<8x8xf32>
    %cst_33 = arith.constant dense<0.000000e+00> : vector<8xf32>
    %80 = vector.multi_reduction <add>, %79, %cst_33 [1] : vector<8x8xf32> to vector<8xf32>
    %81 = vector.shape_cast %80 : vector<8xf32> to vector<8x1xf32>
    %82 = tpu.reciprocal %81 {approx = true} : vector<8x1xf32> -> vector<8x1xf32>
    %83 = vector.broadcast %82 : vector<8x1xf32> to vector<8x8xf32>
    %84 = arith.mulf %79, %83 : vector<8x8xf32>
    %85 = arith.truncf %84 : vector<8x8xf32> to vector<8x8xbf16>
    %cst_34 = arith.constant dense<0.000000e+00> : vector<8x16xf32>
    %86 = tpu.matmul %85, %70, %cst_34 {dimension_numbers = #tpu.dot_dimension_numbers<[1], [0], [0], [1], [0, 0, 1, 1], [], []>} : vector<8x8xbf16>, vector<8x16xf32>, vector<8x16xf32> -> vector<8x16xf32>
    %c0_35 = arith.constant 0 : index
    %c16 = arith.constant 16 : index
    %87 = vector.load %arg21[%c0_35, %c16] : memref<8x32xf32, #tpu.memory_space<vmem>>, vector<8x16xf32>
    tpu.vector_store %arg21[%c0_35, %c16], %86 {strides = array<i32>} : memref<8x32xf32, #tpu.memory_space<vmem>>, vector<8x16xf32>,
    %c0_36 = arith.constant 0 : index
    %c0_37 = arith.constant 0 : index
    %88 = vector.load %arg21[%c0_36, %c0_37] : memref<8x32xf32, #tpu.memory_space<vmem>>, vector<8x32xf32>
    %c0_38 = arith.constant 0 : index
    %c0_39 = arith.constant 0 : index
    %c0_40 = arith.constant 0 : index
    %89 = vector.load %arg8[%c0_38, %c0_39, %c0_40] : memref<2x32x32xbf16, #tpu.memory_space<vmem>>, vector<1x32x32xbf16>
    %90 = vector.shape_cast %89 : vector<1x32x32xbf16> to vector<32x32xbf16>
    %91 = arith.truncf %88 : vector<8x32xf32> to vector<8x32xbf16>
    %cst_41 = arith.constant dense<0.000000e+00> : vector<8x32xf32>
    %92 = tpu.matmul %91, %90, %cst_41 {dimension_numbers = #tpu.dot_dimension_numbers<[1], [0], [0], [1], [0, 0, 1, 1], [], []>} : vector<8x32xbf16>, vector<32x32xbf16>, vector<8x32xf32> -> vector<8x32xf32>
    %93 = arith.addf %13, %92 : vector<8x32xf32>
    %c0_42 = arith.constant 0 : index
    %c0_43 = arith.constant 0 : index
    %c0_44 = arith.constant 0 : index
    %94 = vector.load %arg9[%c0_42, %c0_43, %c0_44] : memref<2x1x32xf32, #tpu.memory_space<vmem>>, vector<1x1x32xf32>
    %95 = vector.shape_cast %94 : vector<1x1x32xf32> to vector<1x32xf32>
    %96 = vector.broadcast %95 : vector<1x32xf32> to vector<8x32xf32>
    %97 = arith.addf %93, %96 : vector<8x32xf32>
    %c0_45 = arith.constant 0 : index
    %c0_46 = arith.constant 0 : index
    %c0_47 = arith.constant 0 : index
    %98 = vector.load %arg10[%c0_45, %c0_46, %c0_47] : memref<2x1x32xf32, #tpu.memory_space<vmem>>, vector<1x1x32xf32>
    %99 = vector.shape_cast %98 : vector<1x1x32xf32> to vector<1x32xf32>
    %c0_48 = arith.constant 0 : index
    %c0_49 = arith.constant 0 : index
    %c0_50 = arith.constant 0 : index
    %100 = vector.load %arg11[%c0_48, %c0_49, %c0_50] : memref<2x1x32xf32, #tpu.memory_space<vmem>>, vector<1x1x32xf32>
    %101 = vector.shape_cast %100 : vector<1x1x32xf32> to vector<1x32xf32>
    %cst_51 = arith.constant dense<0.000000e+00> : vector<8xf32>
    %102 = vector.multi_reduction <add>, %97, %cst_51 [1] : vector<8x32xf32> to vector<8xf32>
    %103 = vector.shape_cast %102 : vector<8xf32> to vector<8x1xf32>
    %cst_52 = arith.constant 3.200000e+01 : f32
    %104 = vector.broadcast %cst_52 : f32 to vector<8x1xf32>
    %105 = arith.divf %103, %104 : vector<8x1xf32>
    %106 = vector.broadcast %105 : vector<8x1xf32> to vector<8x32xf32>
    %107 = arith.subf %97, %106 : vector<8x32xf32>
    %108 = arith.mulf %107, %107 : vector<8x32xf32>
    %cst_53 = arith.constant dense<0.000000e+00> : vector<8xf32>
    %109 = vector.multi_reduction <add>, %108, %cst_53 [1] : vector<8x32xf32> to vector<8xf32>
    %110 = vector.shape_cast %109 : vector<8xf32> to vector<8x1xf32>
    %cst_54 = arith.constant 3.200000e+01 : f32
    %111 = vector.broadcast %cst_54 : f32 to vector<8x1xf32>
    %112 = arith.divf %110, %111 : vector<8x1xf32>
    %113 = vector.broadcast %105 : vector<8x1xf32> to vector<8x32xf32>
    %114 = arith.subf %97, %113 : vector<8x32xf32>
    %cst_55 = arith.constant 9.99999974E-6 : f32
    %115 = vector.broadcast %cst_55 : f32 to vector<8x1xf32>
    %116 = arith.addf %112, %115 : vector<8x1xf32>
    %117 = math.rsqrt %116 : vector<8x1xf32>
    %118 = vector.broadcast %117 : vector<8x1xf32> to vector<8x32xf32>
    %119 = arith.mulf %114, %118 : vector<8x32xf32>
    %120 = vector.broadcast %99 : vector<1x32xf32> to vector<8x32xf32>
    %121 = arith.mulf %119, %120 : vector<8x32xf32>
    %122 = vector.broadcast %101 : vector<1x32xf32> to vector<8x32xf32>
    %123 = arith.addf %121, %122 : vector<8x32xf32>
    %c0_56 = arith.constant 0 : index
    %c0_57 = arith.constant 0 : index
    %c0_58 = arith.constant 0 : index
    %124 = vector.load %arg12[%c0_56, %c0_57, %c0_58] : memref<2x32x128xbf16, #tpu.memory_space<vmem>>, vector<1x32x128xbf16>
    %125 = vector.shape_cast %124 : vector<1x32x128xbf16> to vector<32x128xbf16>
    %126 = arith.truncf %123 : vector<8x32xf32> to vector<8x32xbf16>
    %cst_59 = arith.constant dense<0.000000e+00> : vector<8x128xf32>
    %127 = tpu.matmul %126, %125, %cst_59 {dimension_numbers = #tpu.dot_dimension_numbers<[1], [0], [0], [1], [0, 0, 1, 1], [], []>} : vector<8x32xbf16>, vector<32x128xbf16>, vector<8x128xf32> -> vector<8x128xf32>
    %c0_60 = arith.constant 0 : index
    %c0_61 = arith.constant 0 : index
    %c0_62 = arith.constant 0 : index
    %128 = vector.load %arg13[%c0_60, %c0_61, %c0_62] : memref<2x1x128xf32, #tpu.memory_space<vmem>>, vector<1x1x128xf32>
    %129 = vector.shape_cast %128 : vector<1x1x128xf32> to vector<1x128xf32>
    %130 = vector.broadcast %129 : vector<1x128xf32> to vector<8x128xf32>
    %131 = arith.addf %127, %130 : vector<8x128xf32>
    %132 = arith.mulf %131, %131 : vector<8x128xf32>
    %133 = arith.mulf %131, %132 : vector<8x128xf32>
    %cst_63 = arith.constant 4.471500e-02 : f32
    %134 = vector.broadcast %cst_63 : f32 to vector<8x128xf32>
    %135 = arith.mulf %134, %133 : vector<8x128xf32>
    %136 = arith.addf %131, %135 : vector<8x128xf32>
    %cst_64 = arith.constant 0.797884583 : f32
    %137 = vector.broadcast %cst_64 : f32 to vector<8x128xf32>
    %138 = arith.mulf %137, %136 : vector<8x128xf32>
    %139 = math.tanh %138 : vector<8x128xf32>
    %cst_65 = arith.constant 1.000000e+00 : f32
    %140 = vector.broadcast %cst_65 : f32 to vector<8x128xf32>
    %141 = arith.addf %140, %139 : vector<8x128xf32>
    %cst_66 = arith.constant 5.000000e-01 : f32
    %142 = vector.broadcast %cst_66 : f32 to vector<8x128xf32>
    %143 = arith.mulf %142, %141 : vector<8x128xf32>
    %144 = arith.mulf %131, %143 : vector<8x128xf32>
    %c0_67 = arith.constant 0 : index
    %c0_68 = arith.constant 0 : index
    %c0_69 = arith.constant 0 : index
    %145 = vector.load %arg14[%c0_67, %c0_68, %c0_69] : memref<2x128x32xbf16, #tpu.memory_space<vmem>>, vector<1x128x32xbf16>
    %146 = vector.shape_cast %145 : vector<1x128x32xbf16> to vector<128x32xbf16>
    %147 = arith.truncf %144 : vector<8x128xf32> to vector<8x128xbf16>
    %cst_70 = arith.constant dense<0.000000e+00> : vector<8x32xf32>
    %148 = tpu.matmul %147, %146, %cst_70 {dimension_numbers = #tpu.dot_dimension_numbers<[1], [0], [0], [1], [0, 0, 1, 1], [], []>} : vector<8x128xbf16>, vector<128x32xbf16>, vector<8x32xf32> -> vector<8x32xf32>
    %149 = arith.addf %97, %148 : vector<8x32xf32>
    %c0_71 = arith.constant 0 : index
    %c0_72 = arith.constant 0 : index
    %c0_73 = arith.constant 0 : index
    %150 = vector.load %arg15[%c0_71, %c0_72, %c0_73] : memref<2x1x32xf32, #tpu.memory_space<vmem>>, vector<1x1x32xf32>
    %151 = vector.shape_cast %150 : vector<1x1x32xf32> to vector<1x32xf32>
    %152 = vector.broadcast %151 : vector<1x32xf32> to vector<8x32xf32>
    %153 = arith.addf %149, %152 : vector<8x32xf32>
    %c1 = arith.constant 1 : index
    %c0_74 = arith.constant 0 : index
    %c0_75 = arith.constant 0 : index
    %154 = vector.load %arg4[%c1, %c0_74, %c0_75] : memref<2x1x32xf32, #tpu.memory_space<vmem>>, vector<1x1x32xf32>
    %155 = vector.shape_cast %154 : vector<1x1x32xf32> to vector<1x32xf32>
    %c1_76 = arith.constant 1 : index
    %c0_77 = arith.constant 0 : index
    %c0_78 = arith.constant 0 : index
    %156 = vector.load %arg5[%c1_76, %c0_77, %c0_78] : memref<2x1x32xf32, #tpu.memory_space<vmem>>, vector<1x1x32xf32>
    %157 = vector.shape_cast %156 : vector<1x1x32xf32> to vector<1x32xf32>
    %cst_79 = arith.constant dense<0.000000e+00> : vector<8xf32>
    %158 = vector.multi_reduction <add>, %153, %cst_79 [1] : vector<8x32xf32> to vector<8xf32>
    %159 = vector.shape_cast %158 : vector<8xf32> to vector<8x1xf32>
    %cst_80 = arith.constant 3.200000e+01 : f32
    %160 = vector.broadcast %cst_80 : f32 to vector<8x1xf32>
    %161 = arith.divf %159, %160 : vector<8x1xf32>
    %162 = vector.broadcast %161 : vector<8x1xf32> to vector<8x32xf32>
    %163 = arith.subf %153, %162 : vector<8x32xf32>
    %164 = arith.mulf %163, %163 : vector<8x32xf32>
    %cst_81 = arith.constant dense<0.000000e+00> : vector<8xf32>
    %165 = vector.multi_reduction <add>, %164, %cst_81 [1] : vector<8x32xf32> to vector<8xf32>
    %166 = vector.shape_cast %165 : vector<8xf32> to vector<8x1xf32>
    %cst_82 = arith.constant 3.200000e+01 : f32
    %167 = vector.broadcast %cst_82 : f32 to vector<8x1xf32>
    %168 = arith.divf %166, %167 : vector<8x1xf32>
    %169 = vector.broadcast %161 : vector<8x1xf32> to vector<8x32xf32>
    %170 = arith.subf %153, %169 : vector<8x32xf32>
    %cst_83 = arith.constant 9.99999974E-6 : f32
    %171 = vector.broadcast %cst_83 : f32 to vector<8x1xf32>
    %172 = arith.addf %168, %171 : vector<8x1xf32>
    %173 = math.rsqrt %172 : vector<8x1xf32>
    %174 = vector.broadcast %173 : vector<8x1xf32> to vector<8x32xf32>
    %175 = arith.mulf %170, %174 : vector<8x32xf32>
    %176 = vector.broadcast %155 : vector<1x32xf32> to vector<8x32xf32>
    %177 = arith.mulf %175, %176 : vector<8x32xf32>
    %178 = vector.broadcast %157 : vector<1x32xf32> to vector<8x32xf32>
    %179 = arith.addf %177, %178 : vector<8x32xf32>
    %c1_84 = arith.constant 1 : index
    %c0_85 = arith.constant 0 : index
    %c0_86 = arith.constant 0 : index
    %180 = vector.load %arg6[%c1_84, %c0_85, %c0_86] : memref<2x32x96xbf16, #tpu.memory_space<vmem>>, vector<1x32x96xbf16>
    %181 = vector.shape_cast %180 : vector<1x32x96xbf16> to vector<32x96xbf16>
    %182 = arith.truncf %179 : vector<8x32xf32> to vector<8x32xbf16>
    %cst_87 = arith.constant dense<0.000000e+00> : vector<8x96xf32>
    %183 = tpu.matmul %182, %181, %cst_87 {dimension_numbers = #tpu.dot_dimension_numbers<[1], [0], [0], [1], [0, 0, 1, 1], [], []>} : vector<8x32xbf16>, vector<32x96xbf16>, vector<8x96xf32> -> vector<8x96xf32>
    %c1_88 = arith.constant 1 : index
    %c0_89 = arith.constant 0 : index
    %c0_90 = arith.constant 0 : index
    %184 = vector.load %arg7[%c1_88, %c0_89, %c0_90] : memref<2x1x96xf32, #tpu.memory_space<vmem>>, vector<1x1x96xf32>
    %185 = vector.shape_cast %184 : vector<1x1x96xf32> to vector<1x96xf32>
    %186 = vector.broadcast %185 : vector<1x96xf32> to vector<8x96xf32>
    %187 = arith.addf %183, %186 : vector<8x96xf32>
    %188 = vector.extract_strided_slice %187 {offsets = [0, 0], sizes = [8, 16], strides = [1, 1]} : vector<8x96xf32> to vector<8x16xf32>
    %189 = vector.extract_strided_slice %187 {offsets = [0, 32], sizes = [8, 16], strides = [1, 1]} : vector<8x96xf32> to vector<8x16xf32>
    %190 = vector.extract_strided_slice %187 {offsets = [0, 64], sizes = [8, 16], strides = [1, 1]} : vector<8x96xf32> to vector<8x16xf32>
    %191 = arith.truncf %188 : vector<8x16xf32> to vector<8x16xbf16>
    %192 = arith.truncf %189 : vector<8x16xf32> to vector<8x16xbf16>
    %cst_91 = arith.constant dense<0.000000e+00> : vector<8x8xf32>
    %193 = tpu.matmul %191, %192, %cst_91 {dimension_numbers = #tpu.dot_dimension_numbers<[1], [1], [0], [0], [0, 0, 1, 0], [], []>} : vector<8x16xbf16>, vector<8x16xbf16>, vector<8x8xf32> -> vector<8x8xf32>
    %194 = arith.addf %193, %11 : vector<8x8xf32>
    %cst_92 = arith.constant dense<0xFF800000> : vector<8xf32>
    %195 = vector.multi_reduction <maximumf>, %194, %cst_92 [1] : vector<8x8xf32> to vector<8xf32>
    %196 = vector.shape_cast %195 : vector<8xf32> to vector<8x1xf32>
    %197 = vector.broadcast %196 : vector<8x1xf32> to vector<8x8xf32>
    %198 = arith.subf %194, %197 : vector<8x8xf32>
    %199 = math.exp %198 : vector<8x8xf32>
    %cst_93 = arith.constant dense<0.000000e+00> : vector<8xf32>
    %200 = vector.multi_reduction <add>, %199, %cst_93 [1] : vector<8x8xf32> to vector<8xf32>
    %201 = vector.shape_cast %200 : vector<8xf32> to vector<8x1xf32>
    %202 = tpu.reciprocal %201 {approx = true} : vector<8x1xf32> -> vector<8x1xf32>
    %203 = vector.broadcast %202 : vector<8x1xf32> to vector<8x8xf32>
    %204 = arith.mulf %199, %203 : vector<8x8xf32>
    %205 = arith.truncf %204 : vector<8x8xf32> to vector<8x8xbf16>
    %cst_94 = arith.constant dense<0.000000e+00> : vector<8x16xf32>
    %206 = tpu.matmul %205, %190, %cst_94 {dimension_numbers = #tpu.dot_dimension_numbers<[1], [0], [0], [1], [0, 0, 1, 1], [], []>} : vector<8x8xbf16>, vector<8x16xf32>, vector<8x16xf32> -> vector<8x16xf32>
    %c0_95 = arith.constant 0 : index
    %c0_96 = arith.constant 0 : index
    %207 = vector.load %arg21[%c0_95, %c0_96] : memref<8x32xf32, #tpu.memory_space<vmem>>, vector<8x16xf32>
    tpu.vector_store %arg21[%c0_95, %c0_96], %206 {strides = array<i32>} : memref<8x32xf32, #tpu.memory_space<vmem>>, vector<8x16xf32>,
    %208 = vector.extract_strided_slice %187 {offsets = [0, 16], sizes = [8, 16], strides = [1, 1]} : vector<8x96xf32> to vector<8x16xf32>
    %209 = vector.extract_strided_slice %187 {offsets = [0, 48], sizes = [8, 16], strides = [1, 1]} : vector<8x96xf32> to vector<8x16xf32>
    %210 = vector.extract_strided_slice %187 {offsets = [0, 80], sizes = [8, 16], strides = [1, 1]} : vector<8x96xf32> to vector<8x16xf32>
    %211 = arith.truncf %208 : vector<8x16xf32> to vector<8x16xbf16>
    %212 = arith.truncf %209 : vector<8x16xf32> to vector<8x16xbf16>
    %cst_97 = arith.constant dense<0.000000e+00> : vector<8x8xf32>
    %213 = tpu.matmul %211, %212, %cst_97 {dimension_numbers = #tpu.dot_dimension_numbers<[1], [1], [0], [0], [0, 0, 1, 0], [], []>} : vector<8x16xbf16>, vector<8x16xbf16>, vector<8x8xf32> -> vector<8x8xf32>
    %214 = arith.addf %213, %11 : vector<8x8xf32>
    %cst_98 = arith.constant dense<0xFF800000> : vector<8xf32>
    %215 = vector.multi_reduction <maximumf>, %214, %cst_98 [1] : vector<8x8xf32> to vector<8xf32>
    %216 = vector.shape_cast %215 : vector<8xf32> to vector<8x1xf32>
    %217 = vector.broadcast %216 : vector<8x1xf32> to vector<8x8xf32>
    %218 = arith.subf %214, %217 : vector<8x8xf32>
    %219 = math.exp %218 : vector<8x8xf32>
    %cst_99 = arith.constant dense<0.000000e+00> : vector<8xf32>
    %220 = vector.multi_reduction <add>, %219, %cst_99 [1] : vector<8x8xf32> to vector<8xf32>
    %221 = vector.shape_cast %220 : vector<8xf32> to vector<8x1xf32>
    %222 = tpu.reciprocal %221 {approx = true} : vector<8x1xf32> -> vector<8x1xf32>
    %223 = vector.broadcast %222 : vector<8x1xf32> to vector<8x8xf32>
    %224 = arith.mulf %219, %223 : vector<8x8xf32>
    %225 = arith.truncf %224 : vector<8x8xf32> to vector<8x8xbf16>
    %cst_100 = arith.constant dense<0.000000e+00> : vector<8x16xf32>
    %226 = tpu.matmul %225, %210, %cst_100 {dimension_numbers = #tpu.dot_dimension_numbers<[1], [0], [0], [1], [0, 0, 1, 1], [], []>} : vector<8x8xbf16>, vector<8x16xf32>, vector<8x16xf32> -> vector<8x16xf32>
    %c0_101 = arith.constant 0 : index
    %c16_102 = arith.constant 16 : index
    %227 = vector.load %arg21[%c0_101, %c16_102] : memref<8x32xf32, #tpu.memory_space<vmem>>, vector<8x16xf32>
    tpu.vector_store %arg21[%c0_101, %c16_102], %226 {strides = array<i32>} : memref<8x32xf32, #tpu.memory_space<vmem>>, vector<8x16xf32>,
    %c0_103 = arith.constant 0 : index
    %c0_104 = arith.constant 0 : index
    %228 = vector.load %arg21[%c0_103, %c0_104] : memref<8x32xf32, #tpu.memory_space<vmem>>, vector<8x32xf32>
    %c1_105 = arith.constant 1 : index
    %c0_106 = arith.constant 0 : index
    %c0_107 = arith.constant 0 : index
    %229 = vector.load %arg8[%c1_105, %c0_106, %c0_107] : memref<2x32x32xbf16, #tpu.memory_space<vmem>>, vector<1x32x32xbf16>
    %230 = vector.shape_cast %229 : vector<1x32x32xbf16> to vector<32x32xbf16>
    %231 = arith.truncf %228 : vector<8x32xf32> to vector<8x32xbf16>
    %cst_108 = arith.constant dense<0.000000e+00> : vector<8x32xf32>
    %232 = tpu.matmul %231, %230, %cst_108 {dimension_numbers = #tpu.dot_dimension_numbers<[1], [0], [0], [1], [0, 0, 1, 1], [], []>} : vector<8x32xbf16>, vector<32x32xbf16>, vector<8x32xf32> -> vector<8x32xf32>
    %233 = arith.addf %153, %232 : vector<8x32xf32>
    %c1_109 = arith.constant 1 : index
    %c0_110 = arith.constant 0 : index
    %c0_111 = arith.constant 0 : index
    %234 = vector.load %arg9[%c1_109, %c0_110, %c0_111] : memref<2x1x32xf32, #tpu.memory_space<vmem>>, vector<1x1x32xf32>
    %235 = vector.shape_cast %234 : vector<1x1x32xf32> to vector<1x32xf32>
    %236 = vector.broadcast %235 : vector<1x32xf32> to vector<8x32xf32>
    %237 = arith.addf %233, %236 : vector<8x32xf32>
    %c1_112 = arith.constant 1 : index
    %c0_113 = arith.constant 0 : index
    %c0_114 = arith.constant 0 : index
    %238 = vector.load %arg10[%c1_112, %c0_113, %c0_114] : memref<2x1x32xf32, #tpu.memory_space<vmem>>, vector<1x1x32xf32>
    %239 = vector.shape_cast %238 : vector<1x1x32xf32> to vector<1x32xf32>
    %c1_115 = arith.constant 1 : index
    %c0_116 = arith.constant 0 : index
    %c0_117 = arith.constant 0 : index
    %240 = vector.load %arg11[%c1_115, %c0_116, %c0_117] : memref<2x1x32xf32, #tpu.memory_space<vmem>>, vector<1x1x32xf32>
    %241 = vector.shape_cast %240 : vector<1x1x32xf32> to vector<1x32xf32>
    %cst_118 = arith.constant dense<0.000000e+00> : vector<8xf32>
    %242 = vector.multi_reduction <add>, %237, %cst_118 [1] : vector<8x32xf32> to vector<8xf32>
    %243 = vector.shape_cast %242 : vector<8xf32> to vector<8x1xf32>
    %cst_119 = arith.constant 3.200000e+01 : f32
    %244 = vector.broadcast %cst_119 : f32 to vector<8x1xf32>
    %245 = arith.divf %243, %244 : vector<8x1xf32>
    %246 = vector.broadcast %245 : vector<8x1xf32> to vector<8x32xf32>
    %247 = arith.subf %237, %246 : vector<8x32xf32>
    %248 = arith.mulf %247, %247 : vector<8x32xf32>
    %cst_120 = arith.constant dense<0.000000e+00> : vector<8xf32>
    %249 = vector.multi_reduction <add>, %248, %cst_120 [1] : vector<8x32xf32> to vector<8xf32>
    %250 = vector.shape_cast %249 : vector<8xf32> to vector<8x1xf32>
    %cst_121 = arith.constant 3.200000e+01 : f32
    %251 = vector.broadcast %cst_121 : f32 to vector<8x1xf32>
    %252 = arith.divf %250, %251 : vector<8x1xf32>
    %253 = vector.broadcast %245 : vector<8x1xf32> to vector<8x32xf32>
    %254 = arith.subf %237, %253 : vector<8x32xf32>
    %cst_122 = arith.constant 9.99999974E-6 : f32
    %255 = vector.broadcast %cst_122 : f32 to vector<8x1xf32>
    %256 = arith.addf %252, %255 : vector<8x1xf32>
    %257 = math.rsqrt %256 : vector<8x1xf32>
    %258 = vector.broadcast %257 : vector<8x1xf32> to vector<8x32xf32>
    %259 = arith.mulf %254, %258 : vector<8x32xf32>
    %260 = vector.broadcast %239 : vector<1x32xf32> to vector<8x32xf32>
    %261 = arith.mulf %259, %260 : vector<8x32xf32>
    %262 = vector.broadcast %241 : vector<1x32xf32> to vector<8x32xf32>
    %263 = arith.addf %261, %262 : vector<8x32xf32>
    %c1_123 = arith.constant 1 : index
    %c0_124 = arith.constant 0 : index
    %c0_125 = arith.constant 0 : index
    %264 = vector.load %arg12[%c1_123, %c0_124, %c0_125] : memref<2x32x128xbf16, #tpu.memory_space<vmem>>, vector<1x32x128xbf16>
    %265 = vector.shape_cast %264 : vector<1x32x128xbf16> to vector<32x128xbf16>
    %266 = arith.truncf %263 : vector<8x32xf32> to vector<8x32xbf16>
    %cst_126 = arith.constant dense<0.000000e+00> : vector<8x128xf32>
    %267 = tpu.matmul %266, %265, %cst_126 {dimension_numbers = #tpu.dot_dimension_numbers<[1], [0], [0], [1], [0, 0, 1, 1], [], []>} : vector<8x32xbf16>, vector<32x128xbf16>, vector<8x128xf32> -> vector<8x128xf32>
    %c1_127 = arith.constant 1 : index
    %c0_128 = arith.constant 0 : index
    %c0_129 = arith.constant 0 : index
    %268 = vector.load %arg13[%c1_127, %c0_128, %c0_129] : memref<2x1x128xf32, #tpu.memory_space<vmem>>, vector<1x1x128xf32>
    %269 = vector.shape_cast %268 : vector<1x1x128xf32> to vector<1x128xf32>
    %270 = vector.broadcast %269 : vector<1x128xf32> to vector<8x128xf32>
    %271 = arith.addf %267, %270 : vector<8x128xf32>
    %272 = arith.mulf %271, %271 : vector<8x128xf32>
    %273 = arith.mulf %271, %272 : vector<8x128xf32>
    %cst_130 = arith.constant 4.471500e-02 : f32
    %274 = vector.broadcast %cst_130 : f32 to vector<8x128xf32>
    %275 = arith.mulf %274, %273 : vector<8x128xf32>
    %276 = arith.addf %271, %275 : vector<8x128xf32>
    %cst_131 = arith.constant 0.797884583 : f32
    %277 = vector.broadcast %cst_131 : f32 to vector<8x128xf32>
    %278 = arith.mulf %277, %276 : vector<8x128xf32>
    %279 = math.tanh %278 : vector<8x128xf32>
    %cst_132 = arith.constant 1.000000e+00 : f32
    %280 = vector.broadcast %cst_132 : f32 to vector<8x128xf32>
    %281 = arith.addf %280, %279 : vector<8x128xf32>
    %cst_133 = arith.constant 5.000000e-01 : f32
    %282 = vector.broadcast %cst_133 : f32 to vector<8x128xf32>
    %283 = arith.mulf %282, %281 : vector<8x128xf32>
    %284 = arith.mulf %271, %283 : vector<8x128xf32>
    %c1_134 = arith.constant 1 : index
    %c0_135 = arith.constant 0 : index
    %c0_136 = arith.constant 0 : index
    %285 = vector.load %arg14[%c1_134, %c0_135, %c0_136] : memref<2x128x32xbf16, #tpu.memory_space<vmem>>, vector<1x128x32xbf16>
    %286 = vector.shape_cast %285 : vector<1x128x32xbf16> to vector<128x32xbf16>
    %287 = arith.truncf %284 : vector<8x128xf32> to vector<8x128xbf16>
    %cst_137 = arith.constant dense<0.000000e+00> : vector<8x32xf32>
    %288 = tpu.matmul %287, %286, %cst_137 {dimension_numbers = #tpu.dot_dimension_numbers<[1], [0], [0], [1], [0, 0, 1, 1], [], []>} : vector<8x128xbf16>, vector<128x32xbf16>, vector<8x32xf32> -> vector<8x32xf32>
    %289 = arith.addf %237, %288 : vector<8x32xf32>
    %c1_138 = arith.constant 1 : index
    %c0_139 = arith.constant 0 : index
    %c0_140 = arith.constant 0 : index
    %290 = vector.load %arg15[%c1_138, %c0_139, %c0_140] : memref<2x1x32xf32, #tpu.memory_space<vmem>>, vector<1x1x32xf32>
    %291 = vector.shape_cast %290 : vector<1x1x32xf32> to vector<1x32xf32>
    %292 = vector.broadcast %291 : vector<1x32xf32> to vector<8x32xf32>
    %293 = arith.addf %289, %292 : vector<8x32xf32>
    %c0_141 = arith.constant 0 : index
    %c0_142 = arith.constant 0 : index
    %294 = vector.load %arg20[%c0_141, %c0_142] : memref<8x32xf32, #tpu.memory_space<vmem>>, vector<8x32xf32>
    tpu.vector_store %arg20[%c0_141, %c0_142], %293 {strides = array<i32>} : memref<8x32xf32, #tpu.memory_space<vmem>>, vector<8x32xf32>,
    %295 = arith.index_cast %arg0 : i32 to index
    %296 = memref.load %arg1[%295] : memref<2xi32, #tpu.memory_space<smem>>
    %297 = arith.index_cast %296 : i32 to index
    %c0_143 = arith.constant 0 : index
    %298 = vector.load %arg20[%297, %c0_143] : memref<8x32xf32, #tpu.memory_space<vmem>>, vector<1x32xf32>
    %c0_144 = arith.constant 0 : index
    %c0_145 = arith.constant 0 : index
    %299 = vector.load %arg16[%c0_144, %c0_145] : memref<1x32xf32, #tpu.memory_space<vmem>>, vector<1x32xf32>
    %c0_146 = arith.constant 0 : index
    %c0_147 = arith.constant 0 : index
    %300 = vector.load %arg17[%c0_146, %c0_147] : memref<1x32xf32, #tpu.memory_space<vmem>>, vector<1x32xf32>
    %cst_148 = arith.constant dense<0.000000e+00> : vector<1xf32>
    %301 = vector.multi_reduction <add>, %298, %cst_148 [1] : vector<1x32xf32> to vector<1xf32>
    %302 = vector.shape_cast %301 : vector<1xf32> to vector<1x1xf32>
    %cst_149 = arith.constant 3.200000e+01 : f32
    %303 = vector.broadcast %cst_149 : f32 to vector<1x1xf32>
    %304 = arith.divf %302, %303 : vector<1x1xf32>
    %305 = vector.broadcast %304 : vector<1x1xf32> to vector<1x32xf32>
    %306 = arith.subf %298, %305 : vector<1x32xf32>
    %307 = arith.mulf %306, %306 : vector<1x32xf32>
    %cst_150 = arith.constant dense<0.000000e+00> : vector<1xf32>
    %308 = vector.multi_reduction <add>, %307, %cst_150 [1] : vector<1x32xf32> to vector<1xf32>
    %309 = vector.shape_cast %308 : vector<1xf32> to vector<1x1xf32>
    %cst_151 = arith.constant 3.200000e+01 : f32
    %310 = vector.broadcast %cst_151 : f32 to vector<1x1xf32>
    %311 = arith.divf %309, %310 : vector<1x1xf32>
    %312 = vector.broadcast %304 : vector<1x1xf32> to vector<1x32xf32>
    %313 = arith.subf %298, %312 : vector<1x32xf32>
    %cst_152 = arith.constant 9.99999974E-6 : f32
    %314 = vector.broadcast %cst_152 : f32 to vector<1x1xf32>
    %315 = arith.addf %311, %314 : vector<1x1xf32>
    %316 = math.rsqrt %315 : vector<1x1xf32>
    %317 = vector.broadcast %316 : vector<1x1xf32> to vector<1x32xf32>
    %318 = arith.mulf %313, %317 : vector<1x32xf32>
    %319 = arith.mulf %318, %299 : vector<1x32xf32>
    %320 = arith.addf %319, %300 : vector<1x32xf32>
    %c0_153 = arith.constant 0 : index
    %c0_154 = arith.constant 0 : index
    %321 = vector.load %arg18[%c0_153, %c0_154] : memref<32x64xbf16, #tpu.memory_space<vmem>>, vector<32x64xbf16>
    %322 = arith.truncf %320 : vector<1x32xf32> to vector<1x32xbf16>
    %cst_155 = arith.constant dense<0.000000e+00> : vector<1x64xf32>
    %323 = tpu.matmul %322, %321, %cst_155 {dimension_numbers = #tpu.dot_dimension_numbers<[1], [0], [0], [1], [0, 0, 1, 1], [], []>} : vector<1x32xbf16>, vector<32x64xbf16>, vector<1x64xf32> -> vector<1x64xf32>
    %324 = vector.shape_cast %323 : vector<1x64xf32> to vector<1x1x64xf32>
    %c0_156 = arith.constant 0 : index
    %c0_157 = arith.constant 0 : index
    %c0_158 = arith.constant 0 : index
    %325 = vector.load %arg19[%c0_156, %c0_157, %c0_158] : memref<1x1x64xf32, #tpu.memory_space<vmem>>, vector<1x1x64xf32>
    tpu.vector_store %arg19[%c0_156, %c0_157, %c0_158], %324 {strides = array<i32>} : memref<1x1x64xf32, #tpu.memory_space<vmem>>, vector<1x1x64xf32>,
    return
  }
  func.func @transform_0(%arg0: i32, %arg1: memref<2xi32, #tpu.memory_space<smem>>) -> (i32, i32, i32) {
    %c0_i32 = arith.constant 0 : i32
    %c0_i32_0 = arith.constant 0 : i32
    %c0_i32_1 = arith.constant 0 : i32
    return %arg0, %c0_i32, %c0_i32_0 : i32, i32, i32
  }
  func.func @transform_1(%arg0: i32, %arg1: memref<2xi32, #tpu.memory_space<smem>>) -> (i32, i32, i32) {
    %c0_i32 = arith.constant 0 : i32
    %c0_i32_0 = arith.constant 0 : i32
    %c0_i32_1 = arith.constant 0 : i32
    return %arg0, %c0_i32, %c0_i32_0 : i32, i32, i32
  }
  func.func @transform_2(%arg0: i32, %arg1: memref<2xi32, #tpu.memory_space<smem>>) -> (i32, i32, i32) {
    %c0_i32 = arith.constant 0 : i32
    %c0_i32_0 = arith.constant 0 : i32
    %c0_i32_1 = arith.constant 0 : i32
    %c0_i32_2 = arith.constant 0 : i32
    return %c0_i32, %c0_i32_0, %c0_i32_1 : i32, i32, i32
  }
  func.func @transform_3(%arg0: i32, %arg1: memref<2xi32, #tpu.memory_space<smem>>) -> (i32, i32, i32) {
    %c0_i32 = arith.constant 0 : i32
    %c0_i32_0 = arith.constant 0 : i32
    %c0_i32_1 = arith.constant 0 : i32
    %c0_i32_2 = arith.constant 0 : i32
    return %c0_i32, %c0_i32_0, %c0_i32_1 : i32, i32, i32
  }
  func.func @transform_4(%arg0: i32, %arg1: memref<2xi32, #tpu.memory_space<smem>>) -> (i32, i32, i32) {
    %c0_i32 = arith.constant 0 : i32
    %c0_i32_0 = arith.constant 0 : i32
    %c0_i32_1 = arith.constant 0 : i32
    %c0_i32_2 = arith.constant 0 : i32
    return %c0_i32, %c0_i32_0, %c0_i32_1 : i32, i32, i32
  }
  func.func @transform_5(%arg0: i32, %arg1: memref<2xi32, #tpu.memory_space<smem>>) -> (i32, i32, i32) {
    %c0_i32 = arith.constant 0 : i32
    %c0_i32_0 = arith.constant 0 : i32
    %c0_i32_1 = arith.constant 0 : i32
    %c0_i32_2 = arith.constant 0 : i32
    return %c0_i32, %c0_i32_0, %c0_i32_1 : i32, i32, i32
  }
  func.func @transform_6(%arg0: i32, %arg1: memref<2xi32, #tpu.memory_space<smem>>) -> (i32, i32, i32) {
    %c0_i32 = arith.constant 0 : i32
    %c0_i32_0 = arith.constant 0 : i32
    %c0_i32_1 = arith.constant 0 : i32
    %c0_i32_2 = arith.constant 0 : i32
    return %c0_i32, %c0_i32_0, %c0_i32_1 : i32, i32, i32
  }
  func.func @transform_7(%arg0: i32, %arg1: memref<2xi32, #tpu.memory_space<smem>>) -> (i32, i32, i32) {
    %c0_i32 = arith.constant 0 : i32
    %c0_i32_0 = arith.constant 0 : i32
    %c0_i32_1 = arith.constant 0 : i32
    %c0_i32_2 = arith.constant 0 : i32
    return %c0_i32, %c0_i32_0, %c0_i32_1 : i32, i32, i32
  }
  func.func @transform_8(%arg0: i32, %arg1: memref<2xi32, #tpu.memory_space<smem>>) -> (i32, i32, i32) {
    %c0_i32 = arith.constant 0 : i32
    %c0_i32_0 = arith.constant 0 : i32
    %c0_i32_1 = arith.constant 0 : i32
    %c0_i32_2 = arith.constant 0 : i32
    return %c0_i32, %c0_i32_0, %c0_i32_1 : i32, i32, i32
  }
  func.func @transform_9(%arg0: i32, %arg1: memref<2xi32, #tpu.memory_space<smem>>) -> (i32, i32, i32) {
    %c0_i32 = arith.constant 0 : i32
    %c0_i32_0 = arith.constant 0 : i32
    %c0_i32_1 = arith.constant 0 : i32
    %c0_i32_2 = arith.constant 0 : i32
    return %c0_i32, %c0_i32_0, %c0_i32_1 : i32, i32, i32
  }
  func.func @transform_10(%arg0: i32, %arg1: memref<2xi32, #tpu.memory_space<smem>>) -> (i32, i32, i32) {
    %c0_i32 = arith.constant 0 : i32
    %c0_i32_0 = arith.constant 0 : i32
    %c0_i32_1 = arith.constant 0 : i32
    %c0_i32_2 = arith.constant 0 : i32
    return %c0_i32, %c0_i32_0, %c0_i32_1 : i32, i32, i32
  }
  func.func @transform_11(%arg0: i32, %arg1: memref<2xi32, #tpu.memory_space<smem>>) -> (i32, i32, i32) {
    %c0_i32 = arith.constant 0 : i32
    %c0_i32_0 = arith.constant 0 : i32
    %c0_i32_1 = arith.constant 0 : i32
    %c0_i32_2 = arith.constant 0 : i32
    return %c0_i32, %c0_i32_0, %c0_i32_1 : i32, i32, i32
  }
  func.func @transform_12(%arg0: i32, %arg1: memref<2xi32, #tpu.memory_space<smem>>) -> (i32, i32, i32) {
    %c0_i32 = arith.constant 0 : i32
    %c0_i32_0 = arith.constant 0 : i32
    %c0_i32_1 = arith.constant 0 : i32
    %c0_i32_2 = arith.constant 0 : i32
    return %c0_i32, %c0_i32_0, %c0_i32_1 : i32, i32, i32
  }
  func.func @transform_13(%arg0: i32, %arg1: memref<2xi32, #tpu.memory_space<smem>>) -> (i32, i32, i32) {
    %c0_i32 = arith.constant 0 : i32
    %c0_i32_0 = arith.constant 0 : i32
    %c0_i32_1 = arith.constant 0 : i32
    %c0_i32_2 = arith.constant 0 : i32
    return %c0_i32, %c0_i32_0, %c0_i32_1 : i32, i32, i32
  }
  func.func @transform_14(%arg0: i32, %arg1: memref<2xi32, #tpu.memory_space<smem>>) -> (i32, i32) {
    %c0_i32 = arith.constant 0 : i32
    %c0_i32_0 = arith.constant 0 : i32
    %c0_i32_1 = arith.constant 0 : i32
    return %c0_i32, %c0_i32_0 : i32, i32
  }
  func.func @transform_15(%arg0: i32, %arg1: memref<2xi32, #tpu.memory_space<smem>>) -> (i32, i32) {
    %c0_i32 = arith.constant 0 : i32
    %c0_i32_0 = arith.constant 0 : i32
    %c0_i32_1 = arith.constant 0 : i32
    return %c0_i32, %c0_i32_0 : i32, i32
  }
  func.func @transform_16(%arg0: i32, %arg1: memref<2xi32, #tpu.memory_space<smem>>) -> (i32, i32) {
    %c0_i32 = arith.constant 0 : i32
    %c0_i32_0 = arith.constant 0 : i32
    %c0_i32_1 = arith.constant 0 : i32
    return %c0_i32, %c0_i32_0 : i32, i32
  }
  func.func @transform_17(%arg0: i32, %arg1: memref<2xi32, #tpu.memory_space<smem>>) -> (i32, i32, i32) {
    %c0_i32 = arith.constant 0 : i32
    %c0_i32_0 = arith.constant 0 : i32
    %c0_i32_1 = arith.constant 0 : i32
    return %arg0, %c0_i32, %c0_i32_0 : i32, i32, i32
  }
}

</mosaic_0001>

<bundles_post_ra>
// kernel: _lambda_.1
= control target key start
LH: loop header
LB: loop body
LE: loop exit
PB: predicated region body
PF: predicated region fallthrough
CT: control target
= control target key end

     0   :  { %s3226_s0 = inlined_call_operand.vmem [shape: s32[2], index: 0, kind: input, shape index: {}]   ;;  %s3227_s1 = inlined_call_operand.vmem [shape: f32[2,1,8], index: 1, kind: input, shape index: {}]   ;;  %s3228_s2 = inlined_call_operand.vmem [shape: f32[2,8,32], index: 2, kind: input, shape index: {}]   ;;  %s3229_s3 = inlined_call_operand.vmem [shape: f32[2,1,32], index: 3, kind: input, shape index: {}, may-alias: {3,9}]   ;;  %s3230_s4 = inlined_call_operand.vmem [shape: f32[2,1,32], index: 4, kind: input, shape index: {}, may-alias: {4,8,10,14}]   ;;  %s3231_s5 = inlined_call_operand.vmem [shape: bf16[2,32,96], index: 5, kind: input, shape index: {}]   ;;  %s3232_s6 = inlined_call_operand.vmem [shape: f32[2,1,96], index: 6, kind: input, shape index: {}]   ;;  %s3233_s7 = inlined_call_operand.vmem [shape: bf16[2,32,32], index: 7, kind: input, shape index: {}]   ;;  %s3234_s8 = inlined_call_operand.vmem [shape: f32[2,1,32], index: 8, kind: input, shape index: {}, may-alias: {4,8,10,14}]   ;;  %s3235_s9 = inlined_call_operand.vmem [shape: f32[2,1,32], index: 9, kind: input, shape index: {}, may-alias: {3,9}]   ;;  %s3236_s10 = inlined_call_operand.vmem [shape: f32[2,1,32], index: 10, kind: input, shape index: {}, may-alias: {4,8,10,14}]   ;;  %s3237_s11 = inlined_call_operand.vmem [shape: bf16[2,32,128], index: 11, kind: input, shape index: {}]   ;;  %s3238_s12 = inlined_call_operand.vmem [shape: f32[2,1,128], index: 12, kind: input, shape index: {}]   ;;  %s3239_s13 = inlined_call_operand.vmem [shape: bf16[2,128,32], index: 13, kind: input, shape index: {}]   ;;  %s3240_s14 = inlined_call_operand.vmem [shape: f32[2,1,32], index: 14, kind: input, shape index: {}, may-alias: {4,8,10,14}]   ;;  %s3241_s15 = inlined_call_operand.vmem [shape: f32[1,32], index: 15, kind: input, shape index: {}]   ;;  %s3242_s16 = inlined_call_operand.vmem [shape: f32[1,32], index: 16, kind: input, shape index: {}]   ;;  %s3243_s17 = inlined_call_operand.hbm [shape: bf16[32,64], index: 17, kind: input, shape index: {}]   ;;  %s3244_s18 = inlined_call_operand.hbm [shape: f32[2,1,64], index: 18, kind: output, shape index: {}]  }
   0x1   :  { %3256 = sst [smem:[#allocation17_spill]] %s3226_s0 }
   0x2   :  { %3257 = sst [smem:[#allocation18_spill]] %s3227_s1  ;;  %s3260_s29 = sld [smem:[#allocation17_spill]] }
   0x3   :  { %3258 = sst [smem:[#allocation19_spill]] %s3228_s2 }
   0x4   :  { %3259 = sst [smem:[#allocation20_spill]] %s3238_s12 }
   0x8   :  { %s23_s12 = sshll.u32 %s3260_s29, 4  ;;  %s24_s12 = int_to_ptr.vmem [resolvable:$true] %s23_s12 }
   0x9   :  { %s2560_s30 = scalar_lea.vmem %s24_s12, 16  ;;  %p2565_p1 = scmp.lt.s32.totalorder %s24_s12, %s24_s12 }
   0xa   :  { %p2561_p0 = scmp.ne.s32.totalorder %s24_s12, %s2560_s30  ;;  %p2566_p2 = scmp.lt.s32.totalorder %s2560_s30, %s2560_s30 }
   0xc   :  { %p2567_p3 = por %p2566_p2, %p2565_p1 }
   0xe   :  { %p2568_p4 = pnand %p2567_p3, %p2561_p0 }
  0x10   :  { %2571 = shalt.err (!%p2568_p4)  }
  0x11   :  { %s2670_s0 = smov [#allocation5]  }
  0x12   :  { %26 = dma.vmem_to_smem %s24_s12, 16, %s2670_s0, [#allocation4] }
  0x13   :  { %2644 = dma.done.wait [#allocation4], 16 }
  0x14   :  { %2645 = vsyncadd [#allocation4], 4294967280 }
  0x15   :  { %28 = sfence }
  0x16   :  { %29 = vsyncpa [#allocation7], 0 }
  0x17   :  { %30 = vsyncpa [#allocation8], 0 }
  0x18   :  { %32 = vsyncpa [#allocation8 + $0x1], 0  ;;  %s2783_s19 = smov 0   ;;  %s2785_s1 = smov 0  }
  0x19   :  { %s2787_s20 = smov 0   ;;  %s2789_s21 = smov 0  }
  0x1a LB: > { %3261 = sst [smem:[#allocation13_spill]] %s2664_s20  ;;  %s2804_s12 = sadd.s32 4294967295, %s2668_s21   ;;  %s2668_s21 = sphi %s2789_s21, %s3281_s21   ;;  %s2664_s20 = sphi %s2787_s20, %s3283_s20   ;;  %s2660_s1 = sphi %s2785_s1, %s3285_s1   ;;  %s2656_s19 = sphi %s2783_s19, %s3284_s19  }
  0x1b   : > { %s2131_s22 = sadd.s32 4294967294, %s2668_s21   ;;  %s2808_s2 = sadd.s32 1, %s2668_s21  }
  0x1c   : > { %3262 = sst [smem:[#allocation14_spill]] %s2808_s2  ;;  %s412_s23 = sadd.s32 1, %s2664_s20 }
  0x1d   : > { %s409_s24 = ssub.s32 %s2668_s21, %s2808_s2  ;;  %p422_p5 = scmp.ne.s32.totalorder %s2664_s20, %s2660_s1 }
  0x1e   : > { %p410_p6 = scmp.eq.s32.totalorder %s409_s24, 0  ;;  %p423_p7 = scmp.eq.s32.totalorder %s2804_s12, 1 }
  0x1f   : > { %p428_p8 = scmp.ne.s32.totalorder %s2660_s1, %s2656_s19  ;;  %p429_p9 = scmp.eq.s32.totalorder %s2131_s22, 1 }
  0x20   : > { %s2819_s25 = scalar_select %p410_p6, %s2664_s20, %s412_s23  }
  0x21   : > { %p2821_p10 = por %p423_p7, %p422_p5  ;;  %p2825_p11 = por %p429_p9, %p428_p8 }
  0x22   : > { %3263 = sst [smem:[#allocation15_spill]] %s2819_s25  ;;  %p2132_p12 = scmp.ge.s32.totalorder %s2668_s21, 1 }
  0x23   : > { %s3264_s26 = scalar_select %p2821_p10, 1, 0 }
  0x24   : > { %s3265_s27 = scalar_select %p2825_p11, 1, 0 }
  0x25   : > { %p436_p13 = scmp.lt.s32.totalorder %s2668_s21, 3  ;;  %p3250_p0 = scmp.eq.s32.totalorder %s2804_s12, 0 }
  0x26   : > { %3266 = sst [smem:[#allocation16_spill]] %s3265_s27  ;;  %s2671_s29 = smov [#allocation6]  }
  0x27   : > { %p2832_p1 = pnand %p2132_p12, %p436_p13  ;;  %s490_s30 = sshll.u32 %s2671_s29, 4  ;;  %s491_s30 = int_to_ptr.vmem [resolvable:$true] %s490_s30 }
  0x28   : > { %s2572_s24 = scalar_lea.hbm %s3243_s17, 256 }
  0x29   : > { %s3267_s28 = scalar_select %p2832_p1, 1, 0 }
  0x2a   : > { %p2443_p2 = pneg %p2832_p1  ;;  %p2573_p4 = scmp.ne.s32.totalorder %s3243_s17, %s2572_s24 }
  0x2b   : > { %p2579_p8 = scmp.lt.u32.totalorder %s2572_s24, %s3243_s17 }
  0x2c   : > { %p2840_p3 = pnand %p3250_p0, %p2443_p2 }
  0x2e   : > { %p2574_p5 = pneg %p2840_p3 }
  0x30   : > { %p2575_p6 = pnand %p2574_p5, %p2573_p4 }
  0x32   : > { %p2576_p7 = pneg %p2575_p6 }
  0x34   : > { %p2581_p9 = pnand %p2579_p8, %p2576_p7 }
  0x36   : > { %2584 = shalt.err (!%p2581_p9)
}
  0x37   : > { %s2585_s27 = scalar_lea.vmem %s491_s30, 256  ;;  %p2593_p0 = scmp.lt.s32.totalorder %s491_s30, %s491_s30 }
  0x38   : > { %p2586_p12 = scmp.ne.s32.totalorder %s491_s30, %s2585_s27  ;;  %p2594_p11 = scmp.lt.s32.totalorder %s2585_s27, %s2585_s27 }
  0x3a   : > { %p2588_p13 = pnand %p2586_p12, %p2574_p5  ;;  %p2595_p10 = por %p2594_p11, %p2593_p0 }
  0x3c   : > { %p2589_p2 = pneg %p2588_p13 }
  0x3e   : > { %p2596_p1 = pnand %p2595_p10, %p2589_p2 }
  0x40   : > { %2599 = shalt.err (!%p2596_p1)
}
  0x41   : > { %s2672_s20 = smov 64   ;;  %s2673_s25 = smov 4  }
  0x42   : > { %2446 = dma.hbm_to_vmem [thread:$0]  (!%p2840_p3), %s3243_s17, 256, %s491_s30, [#allocation7], %s2672_s20, %s2672_s20, %s2673_s25  }
  0x43   : > { %p3269_p4 = scmp.ne.s32.totalorder %s3267_s28, 0 }
  0x44   : > { %p3270_p6 = scmp.eq.s32.totalorder (!%p3269_p4), %s2804_s12, 0 }
  0x45   : > { %519 = sbr.rel (%p3269_p4) target bundleno = 6203 (0x183b), region = 88 }
  0x4c   : > { %2647 = dma.done.wait (%p3270_p6), [#allocation7], 256   ;;  %p3271_p5 = pmov %p3270_p6 }
  0x4d   : > { %p572_p10 = scmp.lt.s32.totalorder %s2804_s12, 1  ;;  %s3272_s29 = sld [smem:[#allocation19_spill]]  ;;  %vm598_vm0 = vcmask 261120   ;;  %v2500_v7 = vld [vmem:[%s3231_s5] sm:$0xff]   ;;  %v2674_v8 = vmov 0.0   ;;  %vm2675_vm1 = vmmov 0   ;;  %v580_v32 = vlaneseq }
  0x4e   : > { %2649 = vsyncadd (%p3271_p5), [#allocation7], 4294967040  ;;  %2293 = vmatprep.subr.bf16.mxu1 %v2674_v8  ;;  %2297 = vmatprep.mubr.msk.bf16.mxu1 %vm2675_vm1, %v2674_v8  ;;  %v2501_v9 = vld [vmem:[%s3231_s5 + $0x8] sm:$0xff]   ;;  %v2138_v14 = vld [vmem:[%s3229_s3] ss:$0 sm:$0xff]  ;;  %s2676_s28 = smov 112  }
  0x4f   : > { %s2868_s2 = scalar_select %p572_p10, %s2804_s12, 1  ;;  %2294 = vmatpush3.bf16.msra.mxu1 %v2500_v7  ;;  %2307 = vmatprep.subr.mxu0 %v2674_v8  ;;  %v2139_v16 = vld [vmem:[%s3230_s4] ss:$0 sm:$0xff]  ;;  %vm698_vm2 = vcmask 130048   ;;  %v581_v34 = vshrl.u32 %v580_v32, 7  ;;  %v2679_v36 = vmov 0  }
  0x50   : > { %2295 = vmatprep.subr.bf16.mxu1 %v2674_v8  ;;  %2309 = vmatprep.mubr.msk.bf16.mxu0 %vm2675_vm1, %v2674_v8  ;;  %v2140_v20 = vld [vmem:[%s3232_s6] ss:$0 sm:$0xff]  ;;  %s2677_s20 = smov 96   ;;  %s2678_s25 = smov 80   ;;  %v583_v38 = vand.u32 127, %v580_v32  ;;  %v2680_v40 = vmov -10000.0  }
  0x51   : > { %s2137_s27 = sshll.u32 %s2868_s2, 3  ;;  %v590_v35 = vsub.s32 0, %v581_v34  ;;  %vm745_vm7 = vcmask 64512   ;;  %s3255_s24 = smov 64   ;;  %vm982_vm8 = vcmask 261248   ;;  %vm1963_vm9 = vcmask 253952  }
  0x52   : > { %vm584_vm4 = vcmp.ge.s32.totalorder %v581_v34, %v583_v38  ;;  %v2505_v38 = vld [vmem:[%s3237_s11 + $0x8] sm:$0xff]   ;;  %s1958_s22 = sld [smem:[#allocation5 + %s2804_s12]]  ;;  %s570_s23 = sand.u32 1, %s2660_s1   ;;  %vm2039_vm10 = vcmask 516096  }
  0x53   : > { %s578_s30 = scalar_lea.vmem %s3272_s29, %s2137_s27  ;;  %2296 = vmatpush3.bf16.msra.mxu1 %v2501_v9  ;;  %s3273_s27 = sld [smem:[#allocation18_spill]] }
  0x54   : > { %v2874_v0 = vld [vmem:[%s578_s30] sm:$0xff]  ;;  %2301 = vmatprep.subr.bf16.mxu1 %v2674_v8  ;;  %s3277_s30 = smov 16   ;;  %s571_s29 = scalar_lea.vmem [#allocation9], %s570_s23 }
  0x55   : > { %v599_v1 = vsel %vm598_vm0, %v2874_v0, 0.0  ;;  %p3278_p0 = scmp.ne.s32.totalorder %s3264_s26, 0 }
  0x56   : > { %600 = vadd.xlane.f32.xlu0 %v599_v1 }
  0x59   : > { %s574_s0 = scalar_lea.vmem %s3273_s27, %s2868_s2  ;;  %s3254_s2 = smov 48  }
  0x5a   : > { %v585_v33 = vld [vmem:[%s574_s0] sm:$0x1]  ;;  %s3253_s27 = smov 16   ;;  %s2235_s0 = sshll.u32 %s2804_s12, 4 }
  0x5b   : > { %vm586_vm3 = vcmp.gt.f32.partialorder %v585_v33, 0.5  ;;  %s2684_s12 = smov [#allocation9]  }
  0x5c   : > { %v587_v37 = vsel %vm586_vm3, 1, %v2679_v36 }
  0x5d   : > { %v591_v39 = vrot.slane %v587_v37, %v590_v35 }
  0x5f   : > { %vm592_vm5 = vcmp.eq.s32.totalorder %v591_v39, 1 }
  0x60   : > { %vm593_vm6 = vmand %vm584_vm4, %vm592_vm5 }
  0x61   : > { %v2927_v41 = vsel %vm593_vm6, 0.0, %v2680_v40 }
  0xe3   : > { %v601_v2 = vpop.xlane.xlu0 %600 }
  0xe4   : > { %v603_v3 = vmul.f32 0.03125, %v601_v2 }
  0xe6   : > { %v604_v4 = vsub.f32 %v2874_v0, %v603_v3 }
  0xe8   : > { %v605_v5 = vmul.f32 %v604_v4, %v604_v4 }
  0xea   : > { %v606_v6 = vsel %vm598_vm0, %v605_v5, 0.0 }
  0xeb   : > { %607 = vadd.xlane.f32.xlu0 %v606_v6 }
 0x178   : > { %v608_v10 = vpop.xlane.xlu0 %607 }
 0x179   : > { %v609_v11 = vmul.f32 0.03125, %v608_v10 }
 0x17b   : > { %v610_v12 = vadd.f32 1e-05, %v609_v11 }
 0x17d   : > { %2530 = vrsqrt.f32 %v610_v12  ;;  %v2502_v12 = vld [vmem:[%s3233_s7] sm:$0xff]  }
 0x187   : > { %v2531_v13 = vpop.eup %2530 }
 0x188   : > { %v612_v15 = vmul.f32 %v2531_v13, %v604_v4  ;;  %v2503_v13 = vld [vmem:[%s3233_s7 + $0x8] sm:$0xff]  }
 0x18a   : > { %v619_v17 = vmul.f32 %v2138_v14, %v612_v15 }
 0x18c   : > { %v626_v18 = vadd.f32 %v2139_v16, %v619_v17 }
 0x18e   : > { %v631_v19 = vpack.c.bf16 %v626_v18, %v626_v18 }
 0x190   : > { %2298 = vmatmul.mubr.msk.bf16.vlgmr.msra.gmra.mrb[0].mxu1 %vm598_vm0, %v631_v19 }
 0x191   : > { %2303 = vmatprep.mubr.msk.bf16.mxu1 %vm2675_vm1, %v2674_v8 }
 0x263   : > { %v688_v21 = vpop.f32.mrb[0].mxu1 }
 0x264   : > { %v2906_v22 = vadd.f32 %v2140_v20, %v688_v21  ;;  %v2299_v23 = vpop.f32.mrb[1].mxu1 }
 0x265   : > { %v691_v24 = vpop.f32.mrb[2].mxu1 }
 0x266   : > { %v694_v25 = vpack.c.bf16 %v2906_v22, %v2906_v22  ;;  %v2300_v26 = vpop.f32.mrb[3].mxu1 }
 0x267   : > { %v2151_v26 = vld [vmem:[%s3234_s8] ss:$0 sm:$0xff] }
 0x268   : > { %838 = vrot.lane.b32.xlu0 %v694_v25, %s2676_s28  ;;  %696 = vrot.lane.b32.xlu1 %v694_v25, %s2677_s20 }
 0x26c   : > { %840 = vrot.lane.b32.xlu1 %v694_v25, %s2678_s25 }
 0x2da   : > { %v697_v27 = vpop.permute.xlu1 %696  ;;  %v839_v31 = vpop.permute.xlu0 %838 }
 0x2db   : > { %v703_v28 = vsel %vm698_vm2, %v697_v27, 0 }
 0x2dc   : > { %2302 = vmatpush3.bf16.xpose.msra.mxu1 %v703_v28 }
 0x2dd   : > { %2313 = vmatprep.subr.bf16.mxu1 %v2674_v8 }
 0x2de   : > { %v841_v29 = vpop.permute.xlu1 %840 }
 0x2df   : > { %v846_v30 = vsel %vm698_vm2, %v841_v29, 0 }
 0x2e3   : > { %2304 = vmatmul.mubr.msk.bf16.vlgmr.msra.gmra.mrb[4].mxu1 %vm698_vm2, %v694_v25 }
 0x2e4   : > { %2314 = vmatpush3.bf16.xpose.msra.mxu1 %v846_v30  ;;  %2315 = vmatprep.mubr.msk.bf16.mxu1 %vm2675_vm1, %v2674_v8 }
 0x2e5   : > { %2325 = vmatprep.subr.bf16.mxu1 %v2674_v8 }
 0x2eb   : > { %2316 = vmatmul.mubr.msk.bf16.vlgmr.msra.gmra.mrb[8].mxu1 %vm698_vm2, %v839_v31 }
 0x2ec   : > { %2329 = vmatprep.mubr.msk.bf16.mxu1 %vm2675_vm1, %v2674_v8  ;;  %2326 = vmatpush3.bf16.msra.mxu1 %v2502_v12 }
 0x2ed   : > { %2327 = vmatprep.subr.bf16.mxu1 %v2674_v8 }
 0x2f0   : > { %2328 = vmatpush3.bf16.msra.mxu1 %v2503_v13  ;;  %v2166_v13 = vld [vmem:[%s3240_s14] ss:$0 sm:$0xff] }
 0x2f1   : > { %2341 = vmatprep.subr.bf16.mxu1 %v2674_v8 }
 0x3b6   : > { %v739_v42 = vpop.f32.mrb[4].mxu1 }
 0x3b7   : > { %v740_v43 = vadd.f32 %v739_v42, %v2927_v41  ;;  %v2305_v44 = vpop.f32.mrb[5].mxu1 }
 0x3b8   : > { %v742_v45 = vpop.f32.mrb[6].mxu1  ;;  %v2152_v44 = vld [vmem:[%s3235_s9] ss:$0 sm:$0xff] }
 0x3b9   : > { %v2306_v46 = vpop.f32.mrb[7].mxu1  ;;  %v746_v47 = vsel %vm745_vm7, %v740_v43, -inf }
 0x3ba   : > { %747 = vmax.xlane.f32.xlu1 %v746_v47  ;;  %v2153_v46 = vld [vmem:[%s3236_s10] ss:$0 sm:$0xff] }
 0x3be   : > { %v882_v48 = vpop.f32.mrb[8].mxu1 }
 0x3bf   : > { %v883_v49 = vadd.f32 %v882_v48, %v2927_v41  ;;  %v2317_v50 = vpop.f32.mrb[9].mxu1 }
 0x3c0   : > { %v885_v51 = vpop.f32.mrb[10].mxu1  ;;  %v2506_v50 = vld [vmem:[%s3239_s13] sm:$0xff]  }
 0x3c1   : > { %v2318_v52 = vpop.f32.mrb[11].mxu1  ;;  %v888_v53 = vsel %vm745_vm7, %v883_v49, -inf  ;;  %v2507_v51 = vld [vmem:[%s3239_s13 + $0x8] sm:$0xff]  }
 0x3c2   : > { %889 = vmax.xlane.f32.xlu0 %v888_v53  ;;  %v2508_v52 = vld [vmem:[%s3239_s13 + $0x10] sm:$0xff]   ;;  %v2509_v53 = vld [vmem:[%s3239_s13 + $0x18] sm:$0xff]  }
 0x3d8   : > { %900 = vrot.lane.b32.xlu0 %v2906_v22, %s3254_s2  ;;  %s1959_s2 = scalar_lea.vmem [#allocation2], %s1958_s22 }
 0x447   : > { %v748_v54 = vpop.xlane.xlu1 %747 }
 0x448   : > { %v749_v55 = vsub.f32 %v740_v43, %v748_v54  ;;  %v2510_v54 = vld [vmem:[%s3239_s13 + $0x20] sm:$0xff]  }
 0x44a   : > { %v750_v56 = vmul.f32 1.442695, %v749_v55  ;;  %v2511_v55 = vld [vmem:[%s3239_s13 + $0x28] sm:$0xff]  }
 0x44c   : > { %2532 = vpow2.f32 %v750_v56  ;;  %v2512_v56 = vld [vmem:[%s3239_s13 + $0x30] sm:$0xff]  }
 0x44f   : > { %v890_v57 = vpop.xlane.xlu0 %889 }
 0x450   : > { %v891_v58 = vsub.f32 %v883_v49, %v890_v57  ;;  %v2513_v57 = vld [vmem:[%s3239_s13 + $0x38] sm:$0xff]  }
 0x452   : > { %v892_v59 = vmul.f32 1.442695, %v891_v58 }
 0x453   : > { %v901_v7 = vpop.permute.xlu0 %900 }
 0x454   : > { %2534 = vpow2.f32 %v892_v59 }
 0x456   : > { %v2533_v60 = vpop.eup %2532 }
 0x457   : > { %v752_v61 = vsel %vm745_vm7, %v2533_v60, 0.0 }
 0x458   : > { %753 = vadd.xlane.f32.xlu1 %v752_v61 }
 0x45e   : > { %v2535_v62 = vpop.eup %2534 }
 0x45f   : > { %v894_v63 = vsel %vm745_vm7, %v2535_v62, 0.0 }
 0x460   : > { %895 = vadd.xlane.f32.xlu1 %v894_v63 }
 0x471   : > { %759 = vrot.lane.b32.xlu1 %v2906_v22, %s3255_s24  ;;  %s3184_s24 = scalar_lea.hbm %s3244_s18, %s2235_s0 }
 0x4e5   : > { %v754_v1 = vpop.xlane.xlu1 %753 }
 0x4e6   : > { %2536 = vrcp.f32 %v754_v1 }
 0x4ed   : > { %v896_v2 = vpop.xlane.xlu1 %895 }
 0x4ee   : > { %2538 = vrcp.f32 %v896_v2 }
 0x4f0   : > { %v2537_v3 = vpop.eup %2536 }
 0x4f1   : > { %v760_v4 = vpop.permute.xlu1 %759  ;;  %v756_v5 = vmul.f32 %v2537_v3, %v2533_v60 }
 0x4f2   : > { %2308 = vmatpush3.msra.mxu0 %v760_v4 }
 0x4f3   : > { %2319 = vmatprep.subr.mxu0 %v2674_v8  ;;  %v757_v6 = vpack.c.bf16 %v756_v5, %v756_v5 }
 0x4f5   : > { %2310 = vmatmul.mubr.msk.bf16.vlgmr.msra.gmra.mrb[0].mxu0 %vm745_vm7, %v757_v6 }
 0x4f6   : > { %2320 = vmatpush3.msra.mxu0 %v901_v7  ;;  %2321 = vmatprep.mubr.msk.bf16.mxu0 %vm2675_vm1, %v2674_v8 }
 0x4f7   : > { %2333 = vmatprep.subr.bf16.mxu0 %v2674_v8 }
 0x4f8   : > { %v2539_v9 = vpop.eup %2538 }
 0x4f9   : > { %v898_v10 = vmul.f32 %v2539_v9, %v2535_v62 }
 0x4fb   : > { %v899_v11 = vpack.c.bf16 %v898_v10, %v898_v10 }
 0x4fd   : > { %2322 = vmatmul.mubr.msk.bf16.vlgmr.msra.gmra.mrb[4].mxu0 %vm745_vm7, %v899_v11 }
 0x4fe   : > { %2337 = vmatprep.mubr.msk.bf16.mxu0 %vm2675_vm1, %v2674_v8 }
 0x5c8   : > { %v831_v14 = vpop.f32.mrb[0].mxu0 }
 0x5c9   : > { %837 = vst.msk [vmem:[#allocation3] sm:$0xff] %vm698_vm2, %v831_v14  ;;  %v2311_v15 = vpop.f32.mrb[1].mxu0 }
 0x5ca   : > { %v834_v16 = vpop.f32.mrb[2].mxu0 }
 0x5cb   : > { %v2312_v17 = vpop.f32.mrb[3].mxu0 }
 0x5d0   : > { %v972_v18 = vpop.f32.mrb[4].mxu0 }
 0x5d1   : > { %979 = vrot.lane.b32.xlu1 %v972_v18, %s3253_s27  ;;  %v2323_v19 = vpop.f32.mrb[5].mxu0  ;;  %s3274_s27 = sld [smem:[#allocation20_spill]] }
 0x5d2   : > { %v975_v20 = vpop.f32.mrb[6].mxu0 }
 0x5d3   : > { %v2324_v21 = vpop.f32.mrb[7].mxu0 }
 0x5d7   : > { %v2154_v58 = vld [vmem:[%s3274_s27] ss:$0 sm:$0xff] }
 0x643   : > { %v980_v22 = vpop.permute.xlu1 %979 }
 0x644   : > { %983 = vst.msk [vmem:[#allocation3] sm:$0xff] %vm982_vm8, %v980_v22 }
 0x64b   : > { %v984_v23 = vld [vmem:[#allocation3] sm:$0xff] }
 0x64c   : > { %v989_v24 = vpack.c.bf16 %v984_v23, %v984_v23 }
 0x64e   : > { %2330 = vmatmul.mubr.msk.bf16.vlgmr.msra.gmra.mrb[12].mxu1 %vm598_vm0, %v989_v24 }
 0x64f   : > { %2357 = vmatprep.mubr.msk.bf16.mxu1 %vm2675_vm1, %v2674_v8  ;;  %2342 = vmatpush3.bf16.msra.mxu1 %v2506_v50 }
 0x650   : > { %2343 = vmatprep.subr.bf16.mxu1 %v2674_v8 }
 0x653   : > { %2344 = vmatpush3.bf16.msra.mxu1 %v2507_v51 }
 0x654   : > { %2345 = vmatprep.subr.bf16.mxu1 %v2674_v8 }
 0x657   : > { %2346 = vmatpush3.bf16.msra.mxu1 %v2508_v52 }
 0x658   : > { %2347 = vmatprep.subr.bf16.mxu1 %v2674_v8 }
 0x65b   : > { %2348 = vmatpush3.bf16.msra.mxu1 %v2509_v53 }
 0x65c   : > { %2349 = vmatprep.subr.bf16.mxu1 %v2674_v8 }
 0x65f   : > { %2350 = vmatpush3.bf16.msra.mxu1 %v2510_v54 }
 0x660   : > { %2351 = vmatprep.subr.bf16.mxu1 %v2674_v8 }
 0x663   : > { %2352 = vmatpush3.bf16.msra.mxu1 %v2511_v55 }
 0x664   : > { %2353 = vmatprep.subr.bf16.mxu1 %v2674_v8 }
 0x667   : > { %2354 = vmatpush3.bf16.msra.mxu1 %v2512_v56 }
 0x668   : > { %2355 = vmatprep.subr.bf16.mxu1 %v2674_v8 }
 0x66b   : > { %2356 = vmatpush3.bf16.msra.mxu1 %v2513_v57 }
 0x66c   : > { %2387 = vmatprep.subr.mxu1 %v2674_v8 }
 0x721   : > { %v1039_v25 = vpop.f32.mrb[12].mxu1 }
 0x722   : > { %v1045_v27 = vadd.f32 %v1039_v25, %v2874_v0  ;;  %v2331_v28 = vpop.f32.mrb[13].mxu1  ;;  %v2504_v0 = vld [vmem:[%s3237_s11] sm:$0xff]   ;;  %v2514_v25 = vld [vmem:[%s3231_s5 + $0x10] sm:$0xff]  }
 0x723   : > { %v1042_v29 = vpop.f32.mrb[14].mxu1  ;;  %2334 = vmatpush3.bf16.msra.mxu0 %v2504_v0 }
 0x724   : > { %v2965_v30 = vadd.f32 %v2151_v26, %v1045_v27  ;;  %v2332_v31 = vpop.f32.mrb[15].mxu1  ;;  %2335 = vmatprep.subr.bf16.mxu0 %v2674_v8  ;;  %v2515_v26 = vld [vmem:[%s3231_s5 + $0x18] sm:$0xff]  }
 0x725   : > { %v2169_v31 = vld [vmem:[%s3229_s3 + $0x1] ss:$0 sm:$0xff] }
 0x726   : > { %v1056_v32 = vsel %vm598_vm0, %v2965_v30, 0.0 }
 0x727   : > { %1057 = vadd.xlane.f32.xlu1 %v1056_v32  ;;  %2336 = vmatpush3.bf16.msra.mxu0 %v2505_v38 }
 0x728   : > { %2361 = vmatprep.subr.bf16.mxu0 %v2674_v8 }
 0x7b4   : > { %v1058_v33 = vpop.xlane.xlu1 %1057 }
 0x7b5   : > { %v1059_v34 = vmul.f32 0.03125, %v1058_v33  ;;  %v2170_v33 = vld [vmem:[%s3230_s4 + $0x1] ss:$0 sm:$0xff] }
 0x7b7   : > { %v1060_v35 = vsub.f32 %v2965_v30, %v1059_v34 }
 0x7b9   : > { %v1061_v36 = vmul.f32 %v1060_v35, %v1060_v35 }
 0x7bb   : > { %v1062_v37 = vsel %vm598_vm0, %v1061_v36, 0.0 }
 0x7bc   : > { %1063 = vadd.xlane.f32.xlu0 %v1062_v37  ;;  %v2176_v37 = vld [vmem:[%s3232_s6 + $0x1] ss:$0 sm:$0xff] }
 0x849   : > { %v1064_v39 = vpop.xlane.xlu0 %1063 }
 0x84a   : > { %v1065_v40 = vmul.f32 0.03125, %v1064_v39 }
 0x84c   : > { %v1066_v42 = vadd.f32 1e-05, %v1065_v40 }
 0x84e   : > { %2540 = vrsqrt.f32 %v1066_v42 }
 0x858   : > { %v2541_v43 = vpop.eup %2540 }
 0x859   : > { %v1068_v45 = vmul.f32 %v2541_v43, %v1060_v35 }
 0x85b   : > { %v1075_v47 = vmul.f32 %v2152_v44, %v1068_v45 }
 0x85d   : > { %v1082_v48 = vadd.f32 %v2153_v46, %v1075_v47 }
 0x85f   : > { %v1087_v49 = vpack.c.bf16 %v1082_v48, %v1082_v48 }
 0x861   : > { %2338 = vmatmul.mubr.msk.bf16.vlgmr.msra.gmra.mrb[8].mxu0 %vm598_vm0, %v1087_v49 }
 0x862   : > { %2365 = vmatprep.mubr.msk.bf16.mxu0 %vm2675_vm1, %v2674_v8  ;;  %2362 = vmatpush3.bf16.msra.mxu0 %v2514_v25 }
 0x863   : > { %2363 = vmatprep.subr.bf16.mxu0 %v2674_v8 }
 0x866   : > { %2364 = vmatpush3.bf16.msra.mxu0 %v2515_v26 }
 0x867   : > { %2369 = vmatprep.subr.bf16.mxu0 %v2674_v8 }
 0x934   : > { %v1144_v59 = vpop.f32.mrb[8].mxu0 }
 0x935   : > { %v1145_v60 = vadd.f32 %v2154_v58, %v1144_v59  ;;  %v2339_v61 = vpop.f32.mrb[9].mxu0 }
 0x936   : > { %v1147_v62 = vpop.f32.mrb[10].mxu0 }
 0x937   : > { %v1150_v63 = vmul.f32 %v1145_v60, %v1145_v60  ;;  %v2340_v1 = vpop.f32.mrb[11].mxu0 }
 0x939   : > { %v1151_v2 = vmul.f32 %v1150_v63, %v1145_v60 }
 0x93b   : > { %v1152_v3 = vmul.f32 0.044715, %v1151_v2 }
 0x93d   : > { %v1153_v4 = vadd.f32 %v1152_v3, %v1145_v60 }
 0x93f   : > { %v1154_v5 = vmul.f32 0.7978846, %v1153_v4 }
 0x941   : > { %2542 = vtanh.f32 %v1154_v5 }
 0x94b   : > { %v2543_v6 = vpop.eup %2542 }
 0x94c   : > { %v1156_v7 = vadd.f32 1.0, %v2543_v6 }
 0x94e   : > { %v1157_v9 = vmul.f32 0.5, %v1156_v7 }
 0x950   : > { %v1158_v10 = vmul.f32 %v1157_v9, %v1145_v60 }
 0x952   : > { %v1175_v11 = vpack.c.bf16 %v1158_v10, %v1158_v10 }
 0x954   : > { %2358 = vmatmul.mubr.bf16.vlgmr.msra.gmra.mrb[16].mxu1 %v1175_v11 }
 0x955   : > { %2389 = vmatprep.mubr.msk.bf16.mxu1 %vm2675_vm1, %v2674_v8 }
 0xa27   : > { %v1258_v12 = vpop.f32.mrb[16].mxu1 }
 0xa28   : > { %v1264_v14 = vadd.f32 %v1258_v12, %v2965_v30  ;;  %v2359_v15 = vpop.f32.mrb[17].mxu1 }
 0xa29   : > { %v1261_v16 = vpop.f32.mrb[18].mxu1 }
 0xa2a   : > { %v3029_v17 = vadd.f32 %v2166_v13, %v1264_v14  ;;  %v2360_v18 = vpop.f32.mrb[19].mxu1 }
 0xa2c   : > { %v1277_v19 = vsel %vm598_vm0, %v3029_v17, 0.0 }
 0xa2d   : > { %1278 = vadd.xlane.f32.xlu1 %v1277_v19 }
 0xaba   : > { %v1279_v20 = vpop.xlane.xlu1 %1278 }
 0xabb   : > { %v1280_v21 = vmul.f32 0.03125, %v1279_v20 }
 0xabd   : > { %v1281_v22 = vsub.f32 %v3029_v17, %v1280_v21 }
 0xabf   : > { %v1282_v23 = vmul.f32 %v1281_v22, %v1281_v22 }
 0xac1   : > { %v1283_v24 = vsel %vm598_vm0, %v1282_v23, 0.0  ;;  %v2516_v23 = vld [vmem:[%s3233_s7 + $0x10] sm:$0xff]  }
 0xac2   : > { %1284 = vadd.xlane.f32.xlu1 %v1283_v24  ;;  %v2517_v24 = vld [vmem:[%s3233_s7 + $0x18] sm:$0xff]  }
 0xb4f   : > { %v1285_v27 = vpop.xlane.xlu1 %1284 }
 0xb50   : > { %v1286_v28 = vmul.f32 0.03125, %v1285_v27 }
 0xb52   : > { %v1287_v29 = vadd.f32 1e-05, %v1286_v28 }
 0xb54   : > { %2544 = vrsqrt.f32 %v1287_v29 }
 0xb5e   : > { %v2545_v30 = vpop.eup %2544 }
 0xb5f   : > { %v1289_v32 = vmul.f32 %v2545_v30, %v1281_v22 }
 0xb61   : > { %v1296_v34 = vmul.f32 %v2169_v31, %v1289_v32 }
 0xb63   : > { %v1303_v35 = vadd.f32 %v2170_v33, %v1296_v34  ;;  %v2192_v33 = vld [vmem:[%s3234_s8 + $0x1] ss:$0 sm:$0xff] }
 0xb65   : > { %v1309_v36 = vpack.c.bf16 %v1303_v35, %v1303_v35 }
 0xb67   : > { %2366 = vmatmul.mubr.msk.bf16.vlgmr.msra.gmra.mrb[12].mxu0 %vm598_vm0, %v1309_v36 }
 0xb68   : > { %2371 = vmatprep.mubr.msk.bf16.mxu0 %vm2675_vm1, %v2674_v8 }
 0xc3a   : > { %v1367_v0 = vpop.f32.mrb[12].mxu0 }
 0xc3b   : > { %v3055_v38 = vadd.f32 %v2176_v37, %v1367_v0  ;;  %v2367_v39 = vpop.f32.mrb[13].mxu0 }
 0xc3c   : > { %v1370_v40 = vpop.f32.mrb[14].mxu0 }
 0xc3d   : > { %v1373_v42 = vpack.c.bf16 %v3055_v38, %v3055_v38  ;;  %v2368_v43 = vpop.f32.mrb[15].mxu0 }
 0xc3f   : > { %1375 = vrot.lane.b32.xlu0 %v1373_v42, %s2677_s20  ;;  %s3276_s20 = smov 48  }
 0xc43   : > { %1517 = vrot.lane.b32.xlu0 %v1373_v42, %s2678_s25  ;;  %s2604_s25 = sshll.u32 %s2684_s12, 4  ;;  %s2605_s25 = int_to_ptr.vmem [resolvable:$false] %s2604_s25 }
 0xc44   : > { %s2606_s0 = scalar_lea.vmem %s2605_s25, 32 }
 0xc47   : > { %1515 = vrot.lane.b32.xlu0 %v1373_v42, %s2676_s28  ;;  %s3275_s28 = smov 64  }
 0xcb1   : > { %v1376_v44 = vpop.permute.xlu0 %1375 }
 0xcb2   : > { %v1381_v45 = vsel %vm698_vm2, %v1376_v44, 0 }
 0xcb3   : > { %2370 = vmatpush3.bf16.xpose.msra.mxu0 %v1381_v45  ;;  %v2519_v45 = vld [vmem:[%s3237_s11 + $0x18] sm:$0xff]  }
 0xcb4   : > { %2375 = vmatprep.subr.mxu0 %v2674_v8 }
 0xcb5   : > { %v1518_v61 = vpop.permute.xlu0 %1517 }
 0xcb6   : > { %v1523_v63 = vsel %vm698_vm2, %v1518_v61, 0  ;;  %v2525_v61 = vld [vmem:[%s3239_s13 + $0x68] sm:$0xff]  }
 0xcb9   : > { %v1516_v1 = vpop.permute.xlu0 %1515 }
 0xcba   : > { %2372 = vmatmul.mubr.msk.bf16.vlgmr.msra.gmra.mrb[16].mxu0 %vm698_vm2, %v1373_v42 }
 0xcbb   : > { %2377 = vmatprep.mubr.msk.bf16.mxu0 %vm2675_vm1, %v2674_v8 }
 0xd8d   : > { %v1417_v46 = vpop.f32.mrb[16].mxu0 }
 0xd8e   : > { %v1418_v47 = vadd.f32 %v1417_v46, %v2927_v41  ;;  %v2373_v48 = vpop.f32.mrb[17].mxu0 }
 0xd8f   : > { %v1420_v49 = vpop.f32.mrb[18].mxu0 }
 0xd90   : > { %v2374_v50 = vpop.f32.mrb[19].mxu0  ;;  %v1423_v51 = vsel %vm745_vm7, %v1418_v47, -inf }
 0xd91   : > { %1424 = vmax.xlane.f32.xlu1 %v1423_v51  ;;  %v2195_v50 = vld [vmem:[%s3235_s9 + $0x1] ss:$0 sm:$0xff] }
 0xe1e   : > { %v1425_v52 = vpop.xlane.xlu1 %1424 }
 0xe1f   : > { %v1426_v53 = vsub.f32 %v1418_v47, %v1425_v52  ;;  %v2196_v52 = vld [vmem:[%s3236_s10 + $0x1] ss:$0 sm:$0xff] }
 0xe21   : > { %v1427_v54 = vmul.f32 1.442695, %v1426_v53 }
 0xe23   : > { %2546 = vpow2.f32 %v1427_v54 }
 0xe2d   : > { %v2547_v55 = vpop.eup %2546 }
 0xe2e   : > { %v1429_v56 = vsel %vm745_vm7, %v2547_v55, 0.0 }
 0xe2f   : > { %1430 = vadd.xlane.f32.xlu1 %v1429_v56  ;;  %v2520_v56 = vld [vmem:[%s3239_s13 + $0x40] sm:$0xff]  }
 0xe40   : > { %1436 = vrot.lane.b32.xlu1 %v3055_v38, %s3275_s28  ;;  %s2042_s28 = scalar_lea.sflag [#allocation8], %s570_s23 }
 0xebc   : > { %v1431_v57 = vpop.xlane.xlu1 %1430 }
 0xebd   : > { %2548 = vrcp.f32 %v1431_v57  ;;  %v2521_v57 = vld [vmem:[%s3239_s13 + $0x48] sm:$0xff]  }
 0xec0   : > { %v1437_v58 = vpop.permute.xlu1 %1436 }
 0xec1   : > { %2376 = vmatpush3.msra.mxu0 %v1437_v58  ;;  %v2522_v58 = vld [vmem:[%s3239_s13 + $0x50] sm:$0xff]  }
 0xec2   : > { %2381 = vmatprep.subr.bf16.mxu0 %v2674_v8 }
 0xec7   : > { %v2549_v59 = vpop.eup %2548 }
 0xec8   : > { %v1433_v60 = vmul.f32 %v2549_v59, %v2547_v55  ;;  %v2523_v59 = vld [vmem:[%s3239_s13 + $0x58] sm:$0xff]  }
 0xeca   : > { %v1434_v62 = vpack.c.bf16 %v1433_v60, %v1433_v60  ;;  %v2524_v60 = vld [vmem:[%s3239_s13 + $0x60] sm:$0xff]  }
 0xecc   : > { %2378 = vmatmul.mubr.msk.bf16.vlgmr.msra.gmra.mrb[20].mxu0 %vm745_vm7, %v1434_v62  ;;  %v2526_v62 = vld [vmem:[%s3239_s13 + $0x70] sm:$0xff]  }
 0xecd   : > { %2382 = vmatpush3.bf16.xpose.msra.mxu0 %v1523_v63  ;;  %2383 = vmatprep.mubr.msk.bf16.mxu0 %vm2675_vm1, %v2674_v8  ;;  %v2527_v63 = vld [vmem:[%s3239_s13 + $0x78] sm:$0xff]  }
 0xece   : > { %2393 = vmatprep.subr.bf16.mxu0 %v2674_v8 }
 0xed4   : > { %2384 = vmatmul.mubr.msk.bf16.vlgmr.msra.gmra.mrb[24].mxu0 %vm698_vm2, %v1516_v1  ;;  %v2202_v1 = vld [vmem:[%s3274_s27 + $0x1] ss:$0 sm:$0xff] }
 0xed5   : > { %2397 = vmatprep.mubr.msk.bf16.mxu0 %vm2675_vm1, %v2674_v8  ;;  %2394 = vmatpush3.bf16.msra.mxu0 %v2516_v23 }
 0xed6   : > { %2395 = vmatprep.subr.bf16.mxu0 %v2674_v8 }
 0xed9   : > { %2396 = vmatpush3.bf16.msra.mxu0 %v2517_v24 }
 0xeda   : > { %2409 = vmatprep.subr.bf16.mxu0 %v2674_v8 }
 0xf9f   : > { %v1508_v2 = vpop.f32.mrb[20].mxu0 }
 0xfa0   : > { %1514 = vst.msk [vmem:[#allocation3] sm:$0xff] %vm698_vm2, %v1508_v2  ;;  %v2379_v3 = vpop.f32.mrb[21].mxu0 }
 0xfa1   : > { %v1511_v4 = vpop.f32.mrb[22].mxu0 }
 0xfa2   : > { %v2380_v5 = vpop.f32.mrb[23].mxu0 }
 0xfa7   : > { %v1559_v6 = vpop.f32.mrb[24].mxu0 }
 0xfa8   : > { %v1560_v7 = vadd.f32 %v1559_v6, %v2927_v41  ;;  %v2385_v9 = vpop.f32.mrb[25].mxu0 }
 0xfa9   : > { %v1562_v10 = vpop.f32.mrb[26].mxu0 }
 0xfaa   : > { %v2386_v11 = vpop.f32.mrb[27].mxu0  ;;  %v1565_v12 = vsel %vm745_vm7, %v1560_v7, -inf }
 0xfab   : > { %1566 = vmax.xlane.f32.xlu1 %v1565_v12 }
0x1038   : > { %v1567_v13 = vpop.xlane.xlu1 %1566 }
0x1039   : > { %v1568_v14 = vsub.f32 %v1560_v7, %v1567_v13 }
0x103b   : > { %v1569_v15 = vmul.f32 1.442695, %v1568_v14 }
0x103d   : > { %2550 = vpow2.f32 %v1569_v15 }
0x1047   : > { %v2551_v16 = vpop.eup %2550 }
0x1048   : > { %v1571_v18 = vsel %vm745_vm7, %v2551_v16, 0.0 }
0x1049   : > { %1572 = vadd.xlane.f32.xlu0 %v1571_v18 }
0x105f   : > { %1577 = vrot.lane.b32.xlu0 %v3055_v38, %s3276_s20 }
0x10d6   : > { %v1573_v19 = vpop.xlane.xlu0 %1572 }
0x10d7   : > { %2552 = vrcp.f32 %v1573_v19 }
0x10da   : > { %v1578_v41 = vpop.permute.xlu0 %1577 }
0x10db   : > { %2388 = vmatpush3.msra.mxu1 %v1578_v41  ;;  %v2231_v41 = vld [vmem:[%s3240_s14 + $0x1] ss:$0 sm:$0xff] }
0x10dc   : > { %2401 = vmatprep.subr.bf16.mxu1 %v2674_v8 }
0x10e1   : > { %v2553_v20 = vpop.eup %2552 }
0x10e2   : > { %v1575_v21 = vmul.f32 %v2553_v20, %v2551_v16 }
0x10e4   : > { %v1576_v22 = vpack.c.bf16 %v1575_v21, %v1575_v21 }
0x10e6   : > { %2390 = vmatmul.mubr.msk.bf16.vlgmr.msra.gmra.mrb[20].mxu1 %vm745_vm7, %v1576_v22 }
0x10e7   : > { %2405 = vmatprep.mubr.msk.bf16.mxu1 %vm2675_vm1, %v2674_v8 }
0x11b9   : > { %v1649_v25 = vpop.f32.mrb[20].mxu1 }
0x11ba   : > { %1656 = vrot.lane.b32.xlu1 %v1649_v25, %s3277_s30  ;;  %v2391_v26 = vpop.f32.mrb[21].mxu1  ;;  %s2054_s30 = sshll.u32 %s571_s29, 4  ;;  %s3186_s30 = int_to_ptr.vmem [resolvable:$true] %s2054_s30 }
0x11bb   : > { %v1652_v27 = vpop.f32.mrb[22].mxu1  ;;  %s2600_s20 = scalar_lea.vmem %s3186_s30, 16  ;;  %p2607_p7 = scmp.lt.s32.totalorder %s3186_s30, %s2605_s25 }
0x11bc   : > { %v2392_v28 = vpop.f32.mrb[23].mxu1  ;;  %p2601_p11 = scmp.ne.s32.totalorder %s3186_s30, %s2600_s20  ;;  %p2608_p8 = scmp.lt.s32.totalorder %s2606_s0, %s2600_s20 }
0x11be   : > { %p2602_p1 = pnand %p2601_p11, %p3278_p0  ;;  %p2609_p9 = por %p2608_p8, %p2607_p7 }
0x11c0   : > { %p2603_p3 = pneg %p2602_p1 }
0x11c2   : > { %p2610_p12 = pnand %p2609_p9, %p2603_p3 }
0x122c   : > { %v1657_v29 = vpop.permute.xlu1 %1656 }
0x122d   : > { %1659 = vst.msk [vmem:[#allocation3] sm:$0xff] %vm982_vm8, %v1657_v29 }
0x1234   : > { %v1660_v30 = vld [vmem:[#allocation3] sm:$0xff] }
0x1235   : > { %v1666_v31 = vpack.c.bf16 %v1660_v30, %v1660_v30 }
0x1237   : > { %2398 = vmatmul.mubr.msk.bf16.vlgmr.msra.gmra.mrb[28].mxu0 %vm598_vm0, %v1666_v31 }
0x1238   : > { %2425 = vmatprep.mubr.msk.bf16.mxu0 %vm2675_vm1, %v2674_v8  ;;  %2410 = vmatpush3.bf16.msra.mxu0 %v2520_v56 }
0x1239   : > { %2411 = vmatprep.subr.bf16.mxu0 %v2674_v8 }
0x123c   : > { %2412 = vmatpush3.bf16.msra.mxu0 %v2521_v57 }
0x123d   : > { %2413 = vmatprep.subr.bf16.mxu0 %v2674_v8 }
0x1240   : > { %2414 = vmatpush3.bf16.msra.mxu0 %v2522_v58 }
0x1241   : > { %2415 = vmatprep.subr.bf16.mxu0 %v2674_v8 }
0x1244   : > { %2416 = vmatpush3.bf16.msra.mxu0 %v2523_v59 }
0x1245   : > { %2417 = vmatprep.subr.bf16.mxu0 %v2674_v8 }
0x1248   : > { %2418 = vmatpush3.bf16.msra.mxu0 %v2524_v60 }
0x1249   : > { %2419 = vmatprep.subr.bf16.mxu0 %v2674_v8 }
0x124c   : > { %2420 = vmatpush3.bf16.msra.mxu0 %v2525_v61 }
0x124d   : > { %2421 = vmatprep.subr.bf16.mxu0 %v2674_v8 }
0x1250   : > { %2422 = vmatpush3.bf16.msra.mxu0 %v2526_v62 }
0x1251   : > { %2423 = vmatprep.subr.bf16.mxu0 %v2674_v8 }
0x1254   : > { %2424 = vmatpush3.bf16.msra.mxu0 %v2527_v63 }
0x130a   : > { %v1716_v32 = vpop.f32.mrb[28].mxu0 }
0x130b   : > { %v1722_v34 = vadd.f32 %v1716_v32, %v3029_v17  ;;  %v2399_v35 = vpop.f32.mrb[29].mxu0  ;;  %v2518_v17 = vld [vmem:[%s3237_s11 + $0x10] sm:$0xff]  }
0x130c   : > { %v1719_v36 = vpop.f32.mrb[30].mxu0  ;;  %2402 = vmatpush3.bf16.msra.mxu1 %v2518_v17  ;;  %v2528_v32 = vld [vmem:[#allocation6] sm:$0xff]  }
0x130d   : > { %v3108_v37 = vadd.f32 %v2192_v33, %v1722_v34  ;;  %v2400_v0 = vpop.f32.mrb[31].mxu0  ;;  %2403 = vmatprep.subr.bf16.mxu1 %v2674_v8  ;;  %v2529_v33 = vld [vmem:[#allocation6 + $0x8] sm:$0xff]  }
0x130e   : > { %v1961_v0 = vld [vmem:[%s3241_s15] sm:$0x1] }
0x130f   : > { %v1736_v38 = vsel %vm598_vm0, %v3108_v37, 0.0 }
0x1310   : > { %1737 = vadd.xlane.f32.xlu1 %v1736_v38  ;;  %2404 = vmatpush3.bf16.msra.mxu1 %v2519_v45 }
0x1311   : > { %2429 = vmatprep.subr.bf16.mxu1 %v2674_v8 }
0x139d   : > { %v1738_v39 = vpop.xlane.xlu1 %1737 }
0x139e   : > { %v1739_v40 = vmul.f32 0.03125, %v1738_v39  ;;  %v1962_v39 = vld [vmem:[%s3242_s16] sm:$0x1] }
0x13a0   : > { %v1740_v42 = vsub.f32 %v3108_v37, %v1739_v40 }
0x13a2   : > { %v1741_v43 = vmul.f32 %v1740_v42, %v1740_v42 }
0x13a4   : > { %v1742_v44 = vsel %vm598_vm0, %v1741_v43, 0.0 }
0x13a5   : > { %1743 = vadd.xlane.f32.xlu0 %v1742_v44 }
0x1432   : > { %v1744_v46 = vpop.xlane.xlu0 %1743 }
0x1433   : > { %v1745_v47 = vmul.f32 0.03125, %v1744_v46 }
0x1435   : > { %v1746_v48 = vadd.f32 1e-05, %v1745_v47 }
0x1437   : > { %2554 = vrsqrt.f32 %v1746_v48 }
0x1441   : > { %v2555_v49 = vpop.eup %2554 }
0x1442   : > { %v1748_v51 = vmul.f32 %v2555_v49, %v1740_v42 }
0x1444   : > { %v1755_v53 = vmul.f32 %v2195_v50, %v1748_v51 }
0x1446   : > { %v1762_v54 = vadd.f32 %v2196_v52, %v1755_v53 }
0x1448   : > { %v1768_v55 = vpack.c.bf16 %v1762_v54, %v1762_v54 }
0x144a   : > { %2406 = vmatmul.mubr.msk.bf16.vlgmr.msra.gmra.mrb[24].mxu1 %vm598_vm0, %v1768_v55 }
0x144b   : > { %2433 = vmatprep.mubr.msk.bf16.mxu1 %vm2675_vm1, %v2674_v8  ;;  %2430 = vmatpush3.bf16.msra.mxu1 %v2528_v32 }
0x144c   : > { %2431 = vmatprep.subr.bf16.mxu1 %v2674_v8 }
0x144f   : > { %2432 = vmatpush3.bf16.msra.mxu1 %v2529_v33 }
0x151d   : > { %v1826_v2 = vpop.f32.mrb[24].mxu1 }
0x151e   : > { %v1827_v3 = vadd.f32 %v2202_v1, %v1826_v2  ;;  %v2407_v4 = vpop.f32.mrb[25].mxu1 }
0x151f   : > { %v1829_v5 = vpop.f32.mrb[26].mxu1 }
0x1520   : > { %v1832_v6 = vmul.f32 %v1827_v3, %v1827_v3  ;;  %v2408_v7 = vpop.f32.mrb[27].mxu1 }
0x1522   : > { %v1833_v9 = vmul.f32 %v1832_v6, %v1827_v3 }
0x1524   : > { %v1834_v10 = vmul.f32 0.044715, %v1833_v9 }
0x1526   : > { %v1835_v11 = vadd.f32 %v1834_v10, %v1827_v3 }
0x1528   : > { %v1836_v12 = vmul.f32 0.7978846, %v1835_v11 }
0x152a   : > { %2556 = vtanh.f32 %v1836_v12 }
0x1534   : > { %v2557_v13 = vpop.eup %2556 }
0x1535   : > { %v1838_v14 = vadd.f32 1.0, %v2557_v13 }
0x1537   : > { %v1839_v15 = vmul.f32 0.5, %v1838_v14 }
0x1539   : > { %v1840_v16 = vmul.f32 %v1839_v15, %v1827_v3 }
0x153b   : > { %v1858_v18 = vpack.c.bf16 %v1840_v16, %v1840_v16 }
0x153d   : > { %2426 = vmatmul.mubr.bf16.vlgmr.msra.gmra.mrb[32].mxu0 %v1858_v18 }
0x1610   : > { %v1941_v19 = vpop.f32.mrb[32].mxu0 }
0x1611   : > { %v1947_v20 = vadd.f32 %v1941_v19, %v3108_v37  ;;  %v2427_v21 = vpop.f32.mrb[33].mxu0 }
0x1612   : > { %v1944_v22 = vpop.f32.mrb[34].mxu0 }
0x1613   : > { %v1956_v23 = vadd.f32 %v2231_v41, %v1947_v20  ;;  %v2428_v24 = vpop.f32.mrb[35].mxu0 }
0x1615   : > { %1957 = vst.msk [vmem:[#allocation2] sm:$0xff] %vm598_vm0, %v1956_v23 }
0x161c   : > { %v1960_v25 = vld [vmem:[%s1959_s2] sm:$0x1] }
0x161d   : > { %v1964_v26 = vsel %vm1963_vm9, %v1960_v25, 0.0 }
0x161e   : > { %1965 = vadd.xlane.f32.xlu0 %v1964_v26 }
0x16ab   : > { %v1966_v27 = vpop.xlane.xlu0 %1965 }
0x16ac   : > { %v1967_v28 = vmul.f32 0.03125, %v1966_v27 }
0x16ae   : > { %v1968_v29 = vsub.f32 %v1960_v25, %v1967_v28 }
0x16b0   : > { %v1969_v30 = vmul.f32 %v1968_v29, %v1968_v29 }
0x16b2   : > { %v1970_v31 = vsel %vm1963_vm9, %v1969_v30, 0.0 }
0x16b3   : > { %1971 = vadd.xlane.f32.xlu1 %v1970_v31 }
0x1740   : > { %v1972_v34 = vpop.xlane.xlu1 %1971 }
0x1741   : > { %v1973_v35 = vmul.f32 0.03125, %v1972_v34 }
0x1743   : > { %v1974_v36 = vadd.f32 1e-05, %v1973_v35 }
0x1745   : > { %2558 = vrsqrt.f32 %v1974_v36 }
0x174f   : > { %v2559_v37 = vpop.eup %2558 }
0x1750   : > { %v1976_v38 = vmul.f32 %v2559_v37, %v1968_v29 }
0x1752   : > { %v1977_v40 = vmul.f32 %v1976_v38, %v1961_v0 }
0x1754   : > { %v1978_v42 = vadd.f32 %v1977_v40, %v1962_v39 }
0x1756   : > { %v1983_v43 = vpack.c.bf16 %v1978_v42, %v1978_v42 }
0x1758   : > { %2434 = vmatmul.mubr.msk.bf16.vlgmr.msra.gmra.mrb[28].mxu1 %vm598_vm0, %v1983_v43 }
0x182b   : > { %v2033_v8 = vpop.f32.mrb[28].mxu1 }
0x182c   : > { %2040 = vst.msk [vmem:[%s571_s29] sm:$0x1] %vm2039_vm10, %v2033_v8  ;;  %v2435_v44 = vpop.f32.mrb[29].mxu1 }
0x182d   : > { %v2036_v17 = vpop.f32.mrb[30].mxu1 }
0x182e   : > { %2613 = shalt.err (!%p2610_p12)
}
0x182f   : > { %s2614_s23 = scalar_lea.hbm %s3184_s24, 16  ;;  %s2618_s2 = scalar_lea.hbm %s3244_s18, 32 }
0x1830   : > { %p2615_p13 = scmp.ne.s32.totalorder %s3184_s24, %s2614_s23  ;;  %p2619_p6 = scmp.lt.u32.totalorder %s3184_s24, %s3244_s18 }
0x1831   : > { %p2620_p5 = scmp.lt.u32.totalorder %s2618_s2, %s2614_s23  ;;  %p2622_p11 = scmp.lt.u32.totalorder %s2614_s23, %s3184_s24 }
0x1832   : > { %p2616_p2 = pnand %p2615_p13, %p3278_p0 }
0x1833   : > { %p2621_p10 = por %p2620_p5, %p2619_p6 }
0x1834   : > { %p2617_p4 = pneg %p2616_p2 }
0x1835   : > { %p2623_p1 = por %p2622_p11, %p2621_p10 }
0x1837   : > { %p2624_p3 = pnand %p2623_p1, %p2617_p4 }
0x1839   : > { %2627 = shalt.err (!%p2624_p3)
}
0x183a   : > { %2441 = dma.vmem_to_hbm [thread:$0]  (%p3278_p0), %s3186_s30, 16, %s3184_s24, %s2042_s28   ;;  %v2436_v45 = vpop.f32.mrb[31].mxu1 }
0x183b PF: > { %s3279_s20 = sld [smem:[#allocation16_spill]]  ;;  %p2453_p7 = scmp.ge.s32.totalorder %s2668_s21, 2 }
0x183c   : > { %s2066_s0 = sand.u32 1, %s2656_s19  }
0x183d   : > { %s2067_s29 = scalar_lea.sflag [#allocation8], %s2066_s0 }
0x1841   : > { %p3280_p8 = scmp.ne.s32.totalorder %s3279_s20, 0 }
0x1843   : > { %p2448_p9 = pnand %p2453_p7, %p3280_p8 }
0x1845   : > { %2651 = dma.done.wait (!%p2448_p9), %s2067_s29, 16  }
0x1846   : > { %2653 = vsyncadd (!%p2448_p9), %s2067_s29, 4294967280  ;;  %s3281_s21 = sld [smem:[#allocation14_spill]]  ;;  %s3282_s23 = sld [smem:[#allocation13_spill]] }
0x1847   : > { %s3283_s20 = sld [smem:[#allocation15_spill]]  ;;  %s3284_s19 = smov %s2660_s1 }
0x184c   : > { %p35_p12 = scmp.ge.s32.totalorder %s3281_s21, 4   ;;  %s3285_s1 = smov %s3282_s23 }
0x184e   :  { %37 = sbr.rel (!%p35_p12) target bundleno = 26 (0x1a), region = 144 }
0x1855   :  { %2071 = vsyncpa [#allocation7], 1 }
0x1856   :  { %2073 = vsyncpa [#allocation7 + $0x1], 1 }
0x1857   :  { %2074 = vsyncpa [#allocation8], 1 }
0x1858   :  { %2076 = vsyncpa [#allocation8 + $0x1], 1 }

</bundles_post_ra>
